<compile_context>
chip_gen: v7x
topology: tpu7x:2x2x1
jax: 0.10.0
libtpu: 0.0.40
codegen_flags: <defaults>
</compile_context>

<pallas_src>
import math

import jax
import jax.numpy as jnp
from jax import lax
from jax.experimental import pallas as pl
from jax.experimental.pallas import tpu as pltpu

# Small shapes consistent with the module (d_model lane-aligned to 128).
B, S, D = 2, 8, 128          # batch, seq, d_model
N = B * S                    # total tokens
NHEAD = 4
HD = D // NHEAD              # head dim
NUM_LAYERS = 2
D_FF = 4 * D                 # dim_feedforward = d_model * 4
D_HALF = D // 2              # classifier hidden
EPS = 1e-5                   # nn.LayerNorm default eps

# rows of the packed per-layer (9, D) vector slab
_LN1_G, _LN1_B, _LN2_G, _LN2_B, _BQ, _BK, _BV, _BO, _B2 = range(9)


# ------------------------- in-kernel helpers -------------------------------
def _gelu(x):
    # exact (erf-based) GELU, matching torch nn.GELU / F.gelu default
    return 0.5 * x * (1.0 + lax.erf(x * (1.0 / math.sqrt(2.0))))


def _layernorm(x, gamma, beta):
    mean = jnp.mean(x, axis=-1, keepdims=True)
    var = jnp.mean((x - mean) ** 2, axis=-1, keepdims=True)
    return (x - mean) * lax.rsqrt(var + EPS) * gamma + beta


def _mm(a_f32, w_bf16):
    # bf16 MXU matmul with f32 accumulation; LayerNorm/softmax stay f32.
    return jnp.dot(a_f32.astype(jnp.bfloat16), w_bf16,
                   preferred_element_type=jnp.float32)


# ------------------------------ fused kernel --------------------------------
def fused_forward_kernel(x_ref, pos_ref,
                         wqkv_ref, wo_ref, w1_ref, w2_ref, lvec_ref, b1_ref,
                         fvec_ref, cw1_ref, cvec_ref, cb2_ref,
                         o_ref,
                         xs_ref):
    """One grid step == one encoder layer.  xs_ref carries activations."""
    l = pl.program_id(0)

    # ---- layer 0: positional add (pos table pre-tiled to (N, D) on host) ----
    @pl.when(l == 0)
    def _():
        xs_ref[...] = x_ref[...] + pos_ref[...]          # (N, D) f32

    # per-layer weights (leading layer dim squeezed by BlockSpec)
    lv = lvec_ref[...]                                   # (9, D)   f32
    wqkv = wqkv_ref[...]                                 # (D, 3D)  bf16
    wo = wo_ref[...]                                     # (D, D)   bf16
    w1 = w1_ref[...]                                     # (D, D_FF) bf16
    w2 = w2_ref[...]                                     # (D_FF, D) bf16
    b1 = b1_ref[...]                                     # (1, D_FF) f32

    x = xs_ref[...]                                      # (N, D) f32 carry

    # ---- self-attention block: x = x + SA(LN1(x)) ----
    h = _layernorm(x, lv[_LN1_G:_LN1_G + 1, :], lv[_LN1_B:_LN1_B + 1, :])
    qkv = _mm(h, wqkv)                                   # (N, 3D), one matmul
    # NOTE: 1/sqrt(HD) attention scale is folded into the Q columns of wqkv
    # (and bq) at init_params time -> no runtime multiply here.
    q = qkv[:, 0 * D:1 * D] + lv[_BQ:_BQ + 1, :]
    k = qkv[:, 1 * D:2 * D] + lv[_BK:_BK + 1, :]
    v = qkv[:, 2 * D:3 * D] + lv[_BV:_BV + 1, :]

    attn_rows = []
    for b in range(B):                                   # static: per-batch attn
        rs = slice(b * S, (b + 1) * S)
        ctx_parts = []
        for hh in range(NHEAD):                          # static: per-head scores
            cs = slice(hh * HD, (hh + 1) * HD)
            qh, kh, vh = q[rs, cs], k[rs, cs], v[rs, cs]          # (S, HD)
            # contract over the head dim of BOTH operands: no explicit kh.T
            s = lax.dot_general(qh, kh,
                                dimension_numbers=(((1,), (1,)), ((), ())),
                                preferred_element_type=jnp.float32)  # (S, S)
            # max-subtraction dropped: post-LayerNorm, scale-folded scores are
            # O(1) -> no f32 exp overflow risk (rounding-only difference).
            p = jnp.exp(s)
            p = p * pl.reciprocal(jnp.sum(p, axis=-1, keepdims=True),
                                  approx=True)
            ctx_parts.append(jnp.dot(p, vh,
                                     preferred_element_type=jnp.float32))
        # lane-concat heads -> one deep (S, D)@(D, D) output projection
        ctx = jnp.concatenate(ctx_parts, axis=-1)        # (S, D)
        attn_rows.append(_mm(ctx, wo))                   # (S, D)
    attn = jnp.concatenate(attn_rows, axis=0)            # sublane stack, (N, D)
    x = x + attn + lv[_BO:_BO + 1, :]

    # ---- feed-forward block: x = x + W2 @ gelu(W1 @ LN2(x)) ----
    h2 = _layernorm(x, lv[_LN2_G:_LN2_G + 1, :], lv[_LN2_B:_LN2_B + 1, :])
    t = _gelu(_mm(h2, w1) + b1)
    x = x + _mm(t, w2) + lv[_B2:_B2 + 1, :]
    xs_ref[...] = x

    # ---- last layer: final encoder LayerNorm + classifier head + store ----
    @pl.when(l == NUM_LAYERS - 1)
    def _():
        fv = fvec_ref[...]                               # (2, D): lnf_g, lnf_b
        hf = _layernorm(xs_ref[...], fv[0:1, :], fv[1:2, :])
        cv = cvec_ref[...]                               # (4, D/2): cb1, cln_g, cln_b, cw2^T
        tc = _gelu(_mm(hf, cw1_ref[...]) + cv[0:1, :])
        tc = _layernorm(tc, cv[1:2, :], cv[2:3, :])
        # final (D/2 -> 1) projection on the VPU: broadcast-mul + lane reduce
        # (avoids an MXU matmul with a single output column).
        logits = jnp.sum(tc * cv[3:4, :], axis=-1, keepdims=True) + cb2_ref[...]
        # NOTE: (N,1) store is masked-lane; fine at 16 logits (switch to a
        # lane-dense (1,N) layout if B*S is ever scaled toward >=128).
        o_ref[...] = logits                              # (N, 1)


# ------------------------------ wrapper --------------------------------------
def _const_spec(shape):
    zeros = (0,) * len(shape)
    return pl.BlockSpec(shape, lambda l, _z=zeros: _z)


def _layer_spec(full_shape):
    # (L, a, b) array -> per-layer (a, b) block, leading dim squeezed.
    return pl.BlockSpec((None,) + tuple(full_shape[1:]), lambda l: (l, 0, 0))


@jax.jit
def forward(x, params):
    """x: (B, S, D) float32 -> logits (B, S) float32."""
    # input_proj == nn.Identity() since input_dim == d_model
    args = [
        x.reshape(N, D),          # token-major activations
        params['pos_emb'],        # (N, D)  pre-tiled positional table
        params['wqkv'],           # (L, D, 3D)   bf16 (Q cols pre-scaled)
        params['wo'],             # (L, D, D)    bf16
        params['w1'],             # (L, D, D_FF) bf16
        params['w2'],             # (L, D_FF, D) bf16
        params['lvec'],           # (L, 9, D)    f32 packed LN/bias slab
        params['b1'],             # (L, 1, D_FF) f32
        params['fvec'],           # (2, D)       f32 final LN
        params['cw1'],            # (D, D/2)     bf16
        params['cvec'],           # (4, D/2)     f32 cb1, cln_g, cln_b, cw2^T
        params['cb2'],            # (1, 1)       f32
    ]
    in_specs = [
        _const_spec((N, D)),                  # x
        _const_spec((N, D)),                  # pos_emb
        _layer_spec(params['wqkv'].shape),    # wqkv
        _layer_spec(params['wo'].shape),      # wo
        _layer_spec(params['w1'].shape),      # w1
        _layer_spec(params['w2'].shape),      # w2
        _layer_spec(params['lvec'].shape),    # lvec
        _layer_spec(params['b1'].shape),      # b1
        _const_spec((2, D)),                  # fvec
        _const_spec((D, D_HALF)),             # cw1
        _const_spec((4, D_HALF)),             # cvec
        _const_spec((1, 1)),                  # cb2
    ]
    grid_spec = pltpu.PrefetchScalarGridSpec(
        num_scalar_prefetch=0,
        grid=(NUM_LAYERS,),
        in_specs=in_specs,
        out_specs=_const_spec((N, 1)),
        scratch_shapes=[pltpu.VMEM((N, D), jnp.float32)],  # activation carry
    )
    logits = pl.pallas_call(
        fused_forward_kernel,
        out_shape=jax.ShapeDtypeStruct((N, 1), jnp.float32),
        grid_spec=grid_spec,
        # layer axis is a carried recurrence -> arbitrary.
        # TODO(synk): on v7x, a leading "parallel" batch axis would engage the
        # second TensorCore; omitted here to avoid re-fetching weights /
        # extra grid steps on single-core v5e/v6e.
        compiler_params=pltpu.CompilerParams(
            dimension_semantics=("arbitrary",)),
    )(*args)
    return logits.reshape(B, S)                           # .squeeze(-1)


# --------------------------- parameter setup ---------------------------------
def init_params(key):
    keys = iter(jax.random.split(key, 64))

    def w(shape, scale=0.02):
        return jax.random.normal(next(keys), shape, jnp.float32) * scale

    ones_d = jnp.ones((D,), jnp.float32)
    zeros_d = jnp.zeros((D,), jnp.float32)
    attn_scale = 1.0 / math.sqrt(HD)

    wqkv, wo, w1, w2, lvec, b1 = [], [], [], [], [], []
    pos_tab = w((S, D))           # only first S rows of (max_seq_len, D) used
    for _ in range(NUM_LAYERS):
        m = w((D, 3 * D))                                # packed Wq|Wk|Wv
        # fold the 1/sqrt(head_dim) attention scale into the Q columns
        # (bq is zero here; it would be scaled identically if non-zero).
        m = m.at[:, :D].multiply(attn_scale)
        wqkv.append(m)
        wo.append(w((D, D)))
        w1.append(w((D, D_FF)))
        w2.append(w((D_FF, D)))
        # packed per-layer vectors: ln1_g, ln1_b, ln2_g, ln2_b, bq, bk, bv, bo, b2
        lvec.append(jnp.stack([ones_d, zeros_d, ones_d, zeros_d,
                               zeros_d, zeros_d, zeros_d, zeros_d, zeros_d]))
        b1.append(jnp.zeros((1, D_FF), jnp.float32))

    params = {
        'pos_emb': jnp.tile(pos_tab, (B, 1)),            # pre-tiled to (N, D)
        'wqkv': jnp.stack(wqkv).astype(jnp.bfloat16),
        'wo':   jnp.stack(wo).astype(jnp.bfloat16),
        'w1':   jnp.stack(w1).astype(jnp.bfloat16),
        'w2':   jnp.stack(w2).astype(jnp.bfloat16),
        'lvec': jnp.stack(lvec),
        'b1':   jnp.stack(b1),
        'fvec': jnp.stack([ones_d, zeros_d]),            # final encoder LN
        'cw1':  w((D, D_HALF)).astype(jnp.bfloat16),
        'cvec': jnp.concatenate([
            jnp.zeros((1, D_HALF), jnp.float32),         # cb1
            jnp.ones((1, D_HALF), jnp.float32),          # cln_g
            jnp.zeros((1, D_HALF), jnp.float32),         # cln_b
            w((1, D_HALF)),                              # cw2^T
        ], axis=0),
        'cb2': jnp.zeros((1, 1), jnp.float32),
    }
    return params


if __name__ == "__main__":
    key = jax.random.PRNGKey(0)
    pkey, xkey = jax.random.split(key)
    params = init_params(pkey)
    # attention_mask=None path (no key-padding mask applied)
    # TODO(synk): src_key_padding_mask support (additive -inf mask on the
    # per-batch (S,S) scores) not exercised here.
    x = jax.random.normal(xkey, (B, S, D), jnp.float32)
    out = forward(x, params)
    jax.block_until_ready(out)
    assert out.shape == (B, S) and out.dtype == jnp.float32
    assert bool(jnp.all(jnp.isfinite(out)))
    print("KERNEL_OK")
</pallas_src>

<mosaic_0001>
module attributes {stable_mosaic.version = 11 : i64} {
  func.func @fused_forward_kernel(%arg0: i32, %arg1: memref<16x128xf32, #tpu.memory_space<vmem>>, %arg2: memref<16x128xf32, #tpu.memory_space<vmem>>, %arg3: memref<1x128x384xbf16, #tpu.memory_space<vmem>>, %arg4: memref<1x128x128xbf16, #tpu.memory_space<vmem>>, %arg5: memref<1x128x512xbf16, #tpu.memory_space<vmem>>, %arg6: memref<1x512x128xbf16, #tpu.memory_space<vmem>>, %arg7: memref<1x9x128xf32, #tpu.memory_space<vmem>>, %arg8: memref<1x1x512xf32, #tpu.memory_space<vmem>>, %arg9: memref<2x128xf32, #tpu.memory_space<vmem>>, %arg10: memref<128x64xbf16, #tpu.memory_space<vmem>>, %arg11: memref<4x64xf32, #tpu.memory_space<vmem>>, %arg12: memref<1x1xf32, #tpu.memory_space<vmem>>, %arg13: memref<16x1xf32, #tpu.memory_space<vmem>>, %arg14: memref<16x128xf32, #tpu.memory_space<vmem>>) attributes {dimension_semantics = [#tpu.dimension_semantics<arbitrary>], iteration_bounds = array<i64: 2>, scalar_prefetch = 0 : i64, scratch_operands = 1 : i64, tpu.core_type = #tpu.core_type<tc>, window_params = [{pipeline_mode = #tpu.pipeline_mode<synchronous>, transform_indices = @transform_0, window_bounds = array<i64: 16, 128>}, {pipeline_mode = #tpu.pipeline_mode<synchronous>, transform_indices = @transform_1, window_bounds = array<i64: 16, 128>}, {transform_indices = @transform_2, window_bounds = array<i64: 1, 128, 384>}, {transform_indices = @transform_3, window_bounds = array<i64: 1, 128, 128>}, {transform_indices = @transform_4, window_bounds = array<i64: 1, 128, 512>}, {transform_indices = @transform_5, window_bounds = array<i64: 1, 512, 128>}, {transform_indices = @transform_6, window_bounds = array<i64: 1, 9, 128>}, {transform_indices = @transform_7, window_bounds = array<i64: 1, 1, 512>}, {pipeline_mode = #tpu.pipeline_mode<synchronous>, transform_indices = @transform_8, window_bounds = array<i64: 2, 128>}, {pipeline_mode = #tpu.pipeline_mode<synchronous>, transform_indices = @transform_9, window_bounds = array<i64: 128, 64>}, {pipeline_mode = #tpu.pipeline_mode<synchronous>, transform_indices = @transform_10, window_bounds = array<i64: 4, 64>}, {pipeline_mode = #tpu.pipeline_mode<synchronous>, transform_indices = @transform_11, window_bounds = array<i64: 1, 1>}, {pipeline_mode = #tpu.pipeline_mode<synchronous>, transform_indices = @transform_12, window_bounds = array<i64: 16, 1>}]} {
    %c0_i32 = arith.constant 0 : i32
    %0 = arith.cmpi eq, %arg0, %c0_i32 : i32
    %1 = arith.extui %0 : i1 to i32
    %c0_i32_0 = arith.constant 0 : i32
    %2 = arith.cmpi ne, %1, %c0_i32_0 : i32
    scf.if %2 {
      %c0_64 = arith.constant 0 : index
      %c0_65 = arith.constant 0 : index
      %199 = vector.load %arg1[%c0_64, %c0_65] : memref<16x128xf32, #tpu.memory_space<vmem>>, vector<16x128xf32>
      %c0_66 = arith.constant 0 : index
      %c0_67 = arith.constant 0 : index
      %200 = vector.load %arg2[%c0_66, %c0_67] : memref<16x128xf32, #tpu.memory_space<vmem>>, vector<16x128xf32>
      %201 = arith.addf %199, %200 : vector<16x128xf32>
      %c0_68 = arith.constant 0 : index
      %c0_69 = arith.constant 0 : index
      %202 = vector.load %arg14[%c0_68, %c0_69] : memref<16x128xf32, #tpu.memory_space<vmem>>, vector<16x128xf32>
      tpu.vector_store %arg14[%c0_68, %c0_69], %201 {strides = array<i32>} : memref<16x128xf32, #tpu.memory_space<vmem>>, vector<16x128xf32>,
    } else {
    }
    %c0 = arith.constant 0 : index
    %c0_1 = arith.constant 0 : index
    %c0_2 = arith.constant 0 : index
    %3 = vector.load %arg7[%c0, %c0_1, %c0_2] : memref<1x9x128xf32, #tpu.memory_space<vmem>>, vector<1x9x128xf32>
    %4 = vector.shape_cast %3 : vector<1x9x128xf32> to vector<9x128xf32>
    %c0_3 = arith.constant 0 : index
    %c0_4 = arith.constant 0 : index
    %c0_5 = arith.constant 0 : index
    %5 = vector.load %arg3[%c0_3, %c0_4, %c0_5] : memref<1x128x384xbf16, #tpu.memory_space<vmem>>, vector<1x128x384xbf16>
    %6 = vector.shape_cast %5 : vector<1x128x384xbf16> to vector<128x384xbf16>
    %c0_6 = arith.constant 0 : index
    %c0_7 = arith.constant 0 : index
    %c0_8 = arith.constant 0 : index
    %7 = vector.load %arg4[%c0_6, %c0_7, %c0_8] : memref<1x128x128xbf16, #tpu.memory_space<vmem>>, vector<1x128x128xbf16>
    %8 = vector.shape_cast %7 : vector<1x128x128xbf16> to vector<128x128xbf16>
    %c0_9 = arith.constant 0 : index
    %c0_10 = arith.constant 0 : index
    %c0_11 = arith.constant 0 : index
    %9 = vector.load %arg5[%c0_9, %c0_10, %c0_11] : memref<1x128x512xbf16, #tpu.memory_space<vmem>>, vector<1x128x512xbf16>
    %10 = vector.shape_cast %9 : vector<1x128x512xbf16> to vector<128x512xbf16>
    %c0_12 = arith.constant 0 : index
    %c0_13 = arith.constant 0 : index
    %c0_14 = arith.constant 0 : index
    %11 = vector.load %arg6[%c0_12, %c0_13, %c0_14] : memref<1x512x128xbf16, #tpu.memory_space<vmem>>, vector<1x512x128xbf16>
    %12 = vector.shape_cast %11 : vector<1x512x128xbf16> to vector<512x128xbf16>
    %c0_15 = arith.constant 0 : index
    %c0_16 = arith.constant 0 : index
    %c0_17 = arith.constant 0 : index
    %13 = vector.load %arg8[%c0_15, %c0_16, %c0_17] : memref<1x1x512xf32, #tpu.memory_space<vmem>>, vector<1x1x512xf32>
    %14 = vector.shape_cast %13 : vector<1x1x512xf32> to vector<1x512xf32>
    %c0_18 = arith.constant 0 : index
    %c0_19 = arith.constant 0 : index
    %15 = vector.load %arg14[%c0_18, %c0_19] : memref<16x128xf32, #tpu.memory_space<vmem>>, vector<16x128xf32>
    %16 = vector.extract_strided_slice %4 {offsets = [0, 0], sizes = [1, 128], strides = [1, 1]} : vector<9x128xf32> to vector<1x128xf32>
    %17 = vector.extract_strided_slice %4 {offsets = [1, 0], sizes = [1, 128], strides = [1, 1]} : vector<9x128xf32> to vector<1x128xf32>
    %cst = arith.constant dense<0.000000e+00> : vector<16xf32>
    %18 = vector.multi_reduction <add>, %15, %cst [1] : vector<16x128xf32> to vector<16xf32>
    %19 = vector.shape_cast %18 : vector<16xf32> to vector<16x1xf32>
    %cst_20 = arith.constant 1.280000e+02 : f32
    %20 = vector.broadcast %cst_20 : f32 to vector<16x1xf32>
    %21 = arith.divf %19, %20 : vector<16x1xf32>
    %22 = vector.broadcast %21 : vector<16x1xf32> to vector<16x128xf32>
    %23 = arith.subf %15, %22 : vector<16x128xf32>
    %24 = arith.mulf %23, %23 : vector<16x128xf32>
    %cst_21 = arith.constant dense<0.000000e+00> : vector<16xf32>
    %25 = vector.multi_reduction <add>, %24, %cst_21 [1] : vector<16x128xf32> to vector<16xf32>
    %26 = vector.shape_cast %25 : vector<16xf32> to vector<16x1xf32>
    %cst_22 = arith.constant 1.280000e+02 : f32
    %27 = vector.broadcast %cst_22 : f32 to vector<16x1xf32>
    %28 = arith.divf %26, %27 : vector<16x1xf32>
    %29 = vector.broadcast %21 : vector<16x1xf32> to vector<16x128xf32>
    %30 = arith.subf %15, %29 : vector<16x128xf32>
    %cst_23 = arith.constant 9.99999974E-6 : f32
    %31 = vector.broadcast %cst_23 : f32 to vector<16x1xf32>
    %32 = arith.addf %28, %31 : vector<16x1xf32>
    %33 = math.rsqrt %32 : vector<16x1xf32>
    %34 = vector.broadcast %33 : vector<16x1xf32> to vector<16x128xf32>
    %35 = arith.mulf %30, %34 : vector<16x128xf32>
    %36 = vector.broadcast %16 : vector<1x128xf32> to vector<16x128xf32>
    %37 = arith.mulf %35, %36 : vector<16x128xf32>
    %38 = vector.broadcast %17 : vector<1x128xf32> to vector<16x128xf32>
    %39 = arith.addf %37, %38 : vector<16x128xf32>
    %40 = arith.truncf %39 : vector<16x128xf32> to vector<16x128xbf16>
    %cst_24 = arith.constant dense<0.000000e+00> : vector<16x384xf32>
    %41 = tpu.matmul %40, %6, %cst_24 {dimension_numbers = #tpu.dot_dimension_numbers<[1], [0], [0], [1], [0, 0, 1, 1], [], []>} : vector<16x128xbf16>, vector<128x384xbf16>, vector<16x384xf32> -> vector<16x384xf32>
    %42 = vector.extract_strided_slice %41 {offsets = [0, 0], sizes = [16, 128], strides = [1, 1]} : vector<16x384xf32> to vector<16x128xf32>
    %43 = vector.extract_strided_slice %4 {offsets = [4, 0], sizes = [1, 128], strides = [1, 1]} : vector<9x128xf32> to vector<1x128xf32>
    %44 = vector.broadcast %43 : vector<1x128xf32> to vector<16x128xf32>
    %45 = arith.addf %42, %44 : vector<16x128xf32>
    %46 = vector.extract_strided_slice %41 {offsets = [0, 128], sizes = [16, 128], strides = [1, 1]} : vector<16x384xf32> to vector<16x128xf32>
    %47 = vector.extract_strided_slice %4 {offsets = [5, 0], sizes = [1, 128], strides = [1, 1]} : vector<9x128xf32> to vector<1x128xf32>
    %48 = vector.broadcast %47 : vector<1x128xf32> to vector<16x128xf32>
    %49 = arith.addf %46, %48 : vector<16x128xf32>
    %50 = vector.extract_strided_slice %41 {offsets = [0, 256], sizes = [16, 128], strides = [1, 1]} : vector<16x384xf32> to vector<16x128xf32>
    %51 = vector.extract_strided_slice %4 {offsets = [6, 0], sizes = [1, 128], strides = [1, 1]} : vector<9x128xf32> to vector<1x128xf32>
    %52 = vector.broadcast %51 : vector<1x128xf32> to vector<16x128xf32>
    %53 = arith.addf %50, %52 : vector<16x128xf32>
    %54 = vector.extract_strided_slice %45 {offsets = [0, 0], sizes = [8, 32], strides = [1, 1]} : vector<16x128xf32> to vector<8x32xf32>
    %55 = vector.extract_strided_slice %49 {offsets = [0, 0], sizes = [8, 32], strides = [1, 1]} : vector<16x128xf32> to vector<8x32xf32>
    %56 = vector.extract_strided_slice %53 {offsets = [0, 0], sizes = [8, 32], strides = [1, 1]} : vector<16x128xf32> to vector<8x32xf32>
    %cst_25 = arith.constant dense<0.000000e+00> : vector<8x8xf32>
    %57 = tpu.matmul %54, %55, %cst_25 {dimension_numbers = #tpu.dot_dimension_numbers<[1], [1], [0], [0], [0, 0, 1, 0], [], []>} : vector<8x32xf32>, vector<8x32xf32>, vector<8x8xf32> -> vector<8x8xf32>
    %58 = math.exp %57 : vector<8x8xf32>
    %cst_26 = arith.constant dense<0.000000e+00> : vector<8xf32>
    %59 = vector.multi_reduction <add>, %58, %cst_26 [1] : vector<8x8xf32> to vector<8xf32>
    %60 = vector.shape_cast %59 : vector<8xf32> to vector<8x1xf32>
    %61 = tpu.reciprocal %60 {approx = true} : vector<8x1xf32> -> vector<8x1xf32>
    %62 = vector.broadcast %61 : vector<8x1xf32> to vector<8x8xf32>
    %63 = arith.mulf %58, %62 : vector<8x8xf32>
    %cst_27 = arith.constant dense<0.000000e+00> : vector<8x32xf32>
    %64 = tpu.matmul %63, %56, %cst_27 {dimension_numbers = #tpu.dot_dimension_numbers<[1], [0], [0], [1], [0, 0, 1, 1], [], []>} : vector<8x8xf32>, vector<8x32xf32>, vector<8x32xf32> -> vector<8x32xf32>
    %65 = vector.extract_strided_slice %45 {offsets = [0, 32], sizes = [8, 32], strides = [1, 1]} : vector<16x128xf32> to vector<8x32xf32>
    %66 = vector.extract_strided_slice %49 {offsets = [0, 32], sizes = [8, 32], strides = [1, 1]} : vector<16x128xf32> to vector<8x32xf32>
    %67 = vector.extract_strided_slice %53 {offsets = [0, 32], sizes = [8, 32], strides = [1, 1]} : vector<16x128xf32> to vector<8x32xf32>
    %cst_28 = arith.constant dense<0.000000e+00> : vector<8x8xf32>
    %68 = tpu.matmul %65, %66, %cst_28 {dimension_numbers = #tpu.dot_dimension_numbers<[1], [1], [0], [0], [0, 0, 1, 0], [], []>} : vector<8x32xf32>, vector<8x32xf32>, vector<8x8xf32> -> vector<8x8xf32>
    %69 = math.exp %68 : vector<8x8xf32>
    %cst_29 = arith.constant dense<0.000000e+00> : vector<8xf32>
    %70 = vector.multi_reduction <add>, %69, %cst_29 [1] : vector<8x8xf32> to vector<8xf32>
    %71 = vector.shape_cast %70 : vector<8xf32> to vector<8x1xf32>
    %72 = tpu.reciprocal %71 {approx = true} : vector<8x1xf32> -> vector<8x1xf32>
    %73 = vector.broadcast %72 : vector<8x1xf32> to vector<8x8xf32>
    %74 = arith.mulf %69, %73 : vector<8x8xf32>
    %cst_30 = arith.constant dense<0.000000e+00> : vector<8x32xf32>
    %75 = tpu.matmul %74, %67, %cst_30 {dimension_numbers = #tpu.dot_dimension_numbers<[1], [0], [0], [1], [0, 0, 1, 1], [], []>} : vector<8x8xf32>, vector<8x32xf32>, vector<8x32xf32> -> vector<8x32xf32>
    %76 = vector.extract_strided_slice %45 {offsets = [0, 64], sizes = [8, 32], strides = [1, 1]} : vector<16x128xf32> to vector<8x32xf32>
    %77 = vector.extract_strided_slice %49 {offsets = [0, 64], sizes = [8, 32], strides = [1, 1]} : vector<16x128xf32> to vector<8x32xf32>
    %78 = vector.extract_strided_slice %53 {offsets = [0, 64], sizes = [8, 32], strides = [1, 1]} : vector<16x128xf32> to vector<8x32xf32>
    %cst_31 = arith.constant dense<0.000000e+00> : vector<8x8xf32>
    %79 = tpu.matmul %76, %77, %cst_31 {dimension_numbers = #tpu.dot_dimension_numbers<[1], [1], [0], [0], [0, 0, 1, 0], [], []>} : vector<8x32xf32>, vector<8x32xf32>, vector<8x8xf32> -> vector<8x8xf32>
    %80 = math.exp %79 : vector<8x8xf32>
    %cst_32 = arith.constant dense<0.000000e+00> : vector<8xf32>
    %81 = vector.multi_reduction <add>, %80, %cst_32 [1] : vector<8x8xf32> to vector<8xf32>
    %82 = vector.shape_cast %81 : vector<8xf32> to vector<8x1xf32>
    %83 = tpu.reciprocal %82 {approx = true} : vector<8x1xf32> -> vector<8x1xf32>
    %84 = vector.broadcast %83 : vector<8x1xf32> to vector<8x8xf32>
    %85 = arith.mulf %80, %84 : vector<8x8xf32>
    %cst_33 = arith.constant dense<0.000000e+00> : vector<8x32xf32>
    %86 = tpu.matmul %85, %78, %cst_33 {dimension_numbers = #tpu.dot_dimension_numbers<[1], [0], [0], [1], [0, 0, 1, 1], [], []>} : vector<8x8xf32>, vector<8x32xf32>, vector<8x32xf32> -> vector<8x32xf32>
    %87 = vector.extract_strided_slice %45 {offsets = [0, 96], sizes = [8, 32], strides = [1, 1]} : vector<16x128xf32> to vector<8x32xf32>
    %88 = vector.extract_strided_slice %49 {offsets = [0, 96], sizes = [8, 32], strides = [1, 1]} : vector<16x128xf32> to vector<8x32xf32>
    %89 = vector.extract_strided_slice %53 {offsets = [0, 96], sizes = [8, 32], strides = [1, 1]} : vector<16x128xf32> to vector<8x32xf32>
    %cst_34 = arith.constant dense<0.000000e+00> : vector<8x8xf32>
    %90 = tpu.matmul %87, %88, %cst_34 {dimension_numbers = #tpu.dot_dimension_numbers<[1], [1], [0], [0], [0, 0, 1, 0], [], []>} : vector<8x32xf32>, vector<8x32xf32>, vector<8x8xf32> -> vector<8x8xf32>
    %91 = math.exp %90 : vector<8x8xf32>
    %cst_35 = arith.constant dense<0.000000e+00> : vector<8xf32>
    %92 = vector.multi_reduction <add>, %91, %cst_35 [1] : vector<8x8xf32> to vector<8xf32>
    %93 = vector.shape_cast %92 : vector<8xf32> to vector<8x1xf32>
    %94 = tpu.reciprocal %93 {approx = true} : vector<8x1xf32> -> vector<8x1xf32>
    %95 = vector.broadcast %94 : vector<8x1xf32> to vector<8x8xf32>
    %96 = arith.mulf %91, %95 : vector<8x8xf32>
    %cst_36 = arith.constant dense<0.000000e+00> : vector<8x32xf32>
    %97 = tpu.matmul %96, %89, %cst_36 {dimension_numbers = #tpu.dot_dimension_numbers<[1], [0], [0], [1], [0, 0, 1, 1], [], []>} : vector<8x8xf32>, vector<8x32xf32>, vector<8x32xf32> -> vector<8x32xf32>
    %98 = tpu.concatenate %64, %75, %86, %97 in 1 : vector<8x32xf32>, vector<8x32xf32>, vector<8x32xf32>, vector<8x32xf32> -> vector<8x128xf32>
    %99 = arith.truncf %98 : vector<8x128xf32> to vector<8x128xbf16>
    %cst_37 = arith.constant dense<0.000000e+00> : vector<8x128xf32>
    %100 = tpu.matmul %99, %8, %cst_37 {dimension_numbers = #tpu.dot_dimension_numbers<[1], [0], [0], [1], [0, 0, 1, 1], [], []>} : vector<8x128xbf16>, vector<128x128xbf16>, vector<8x128xf32> -> vector<8x128xf32>
    %101 = vector.extract_strided_slice %45 {offsets = [8, 0], sizes = [8, 32], strides = [1, 1]} : vector<16x128xf32> to vector<8x32xf32>
    %102 = vector.extract_strided_slice %49 {offsets = [8, 0], sizes = [8, 32], strides = [1, 1]} : vector<16x128xf32> to vector<8x32xf32>
    %103 = vector.extract_strided_slice %53 {offsets = [8, 0], sizes = [8, 32], strides = [1, 1]} : vector<16x128xf32> to vector<8x32xf32>
    %cst_38 = arith.constant dense<0.000000e+00> : vector<8x8xf32>
    %104 = tpu.matmul %101, %102, %cst_38 {dimension_numbers = #tpu.dot_dimension_numbers<[1], [1], [0], [0], [0, 0, 1, 0], [], []>} : vector<8x32xf32>, vector<8x32xf32>, vector<8x8xf32> -> vector<8x8xf32>
    %105 = math.exp %104 : vector<8x8xf32>
    %cst_39 = arith.constant dense<0.000000e+00> : vector<8xf32>
    %106 = vector.multi_reduction <add>, %105, %cst_39 [1] : vector<8x8xf32> to vector<8xf32>
    %107 = vector.shape_cast %106 : vector<8xf32> to vector<8x1xf32>
    %108 = tpu.reciprocal %107 {approx = true} : vector<8x1xf32> -> vector<8x1xf32>
    %109 = vector.broadcast %108 : vector<8x1xf32> to vector<8x8xf32>
    %110 = arith.mulf %105, %109 : vector<8x8xf32>
    %cst_40 = arith.constant dense<0.000000e+00> : vector<8x32xf32>
    %111 = tpu.matmul %110, %103, %cst_40 {dimension_numbers = #tpu.dot_dimension_numbers<[1], [0], [0], [1], [0, 0, 1, 1], [], []>} : vector<8x8xf32>, vector<8x32xf32>, vector<8x32xf32> -> vector<8x32xf32>
    %112 = vector.extract_strided_slice %45 {offsets = [8, 32], sizes = [8, 32], strides = [1, 1]} : vector<16x128xf32> to vector<8x32xf32>
    %113 = vector.extract_strided_slice %49 {offsets = [8, 32], sizes = [8, 32], strides = [1, 1]} : vector<16x128xf32> to vector<8x32xf32>
    %114 = vector.extract_strided_slice %53 {offsets = [8, 32], sizes = [8, 32], strides = [1, 1]} : vector<16x128xf32> to vector<8x32xf32>
    %cst_41 = arith.constant dense<0.000000e+00> : vector<8x8xf32>
    %115 = tpu.matmul %112, %113, %cst_41 {dimension_numbers = #tpu.dot_dimension_numbers<[1], [1], [0], [0], [0, 0, 1, 0], [], []>} : vector<8x32xf32>, vector<8x32xf32>, vector<8x8xf32> -> vector<8x8xf32>
    %116 = math.exp %115 : vector<8x8xf32>
    %cst_42 = arith.constant dense<0.000000e+00> : vector<8xf32>
    %117 = vector.multi_reduction <add>, %116, %cst_42 [1] : vector<8x8xf32> to vector<8xf32>
    %118 = vector.shape_cast %117 : vector<8xf32> to vector<8x1xf32>
    %119 = tpu.reciprocal %118 {approx = true} : vector<8x1xf32> -> vector<8x1xf32>
    %120 = vector.broadcast %119 : vector<8x1xf32> to vector<8x8xf32>
    %121 = arith.mulf %116, %120 : vector<8x8xf32>
    %cst_43 = arith.constant dense<0.000000e+00> : vector<8x32xf32>
    %122 = tpu.matmul %121, %114, %cst_43 {dimension_numbers = #tpu.dot_dimension_numbers<[1], [0], [0], [1], [0, 0, 1, 1], [], []>} : vector<8x8xf32>, vector<8x32xf32>, vector<8x32xf32> -> vector<8x32xf32>
    %123 = vector.extract_strided_slice %45 {offsets = [8, 64], sizes = [8, 32], strides = [1, 1]} : vector<16x128xf32> to vector<8x32xf32>
    %124 = vector.extract_strided_slice %49 {offsets = [8, 64], sizes = [8, 32], strides = [1, 1]} : vector<16x128xf32> to vector<8x32xf32>
    %125 = vector.extract_strided_slice %53 {offsets = [8, 64], sizes = [8, 32], strides = [1, 1]} : vector<16x128xf32> to vector<8x32xf32>
    %cst_44 = arith.constant dense<0.000000e+00> : vector<8x8xf32>
    %126 = tpu.matmul %123, %124, %cst_44 {dimension_numbers = #tpu.dot_dimension_numbers<[1], [1], [0], [0], [0, 0, 1, 0], [], []>} : vector<8x32xf32>, vector<8x32xf32>, vector<8x8xf32> -> vector<8x8xf32>
    %127 = math.exp %126 : vector<8x8xf32>
    %cst_45 = arith.constant dense<0.000000e+00> : vector<8xf32>
    %128 = vector.multi_reduction <add>, %127, %cst_45 [1] : vector<8x8xf32> to vector<8xf32>
    %129 = vector.shape_cast %128 : vector<8xf32> to vector<8x1xf32>
    %130 = tpu.reciprocal %129 {approx = true} : vector<8x1xf32> -> vector<8x1xf32>
    %131 = vector.broadcast %130 : vector<8x1xf32> to vector<8x8xf32>
    %132 = arith.mulf %127, %131 : vector<8x8xf32>
    %cst_46 = arith.constant dense<0.000000e+00> : vector<8x32xf32>
    %133 = tpu.matmul %132, %125, %cst_46 {dimension_numbers = #tpu.dot_dimension_numbers<[1], [0], [0], [1], [0, 0, 1, 1], [], []>} : vector<8x8xf32>, vector<8x32xf32>, vector<8x32xf32> -> vector<8x32xf32>
    %134 = vector.extract_strided_slice %45 {offsets = [8, 96], sizes = [8, 32], strides = [1, 1]} : vector<16x128xf32> to vector<8x32xf32>
    %135 = vector.extract_strided_slice %49 {offsets = [8, 96], sizes = [8, 32], strides = [1, 1]} : vector<16x128xf32> to vector<8x32xf32>
    %136 = vector.extract_strided_slice %53 {offsets = [8, 96], sizes = [8, 32], strides = [1, 1]} : vector<16x128xf32> to vector<8x32xf32>
    %cst_47 = arith.constant dense<0.000000e+00> : vector<8x8xf32>
    %137 = tpu.matmul %134, %135, %cst_47 {dimension_numbers = #tpu.dot_dimension_numbers<[1], [1], [0], [0], [0, 0, 1, 0], [], []>} : vector<8x32xf32>, vector<8x32xf32>, vector<8x8xf32> -> vector<8x8xf32>
    %138 = math.exp %137 : vector<8x8xf32>
    %cst_48 = arith.constant dense<0.000000e+00> : vector<8xf32>
    %139 = vector.multi_reduction <add>, %138, %cst_48 [1] : vector<8x8xf32> to vector<8xf32>
    %140 = vector.shape_cast %139 : vector<8xf32> to vector<8x1xf32>
    %141 = tpu.reciprocal %140 {approx = true} : vector<8x1xf32> -> vector<8x1xf32>
    %142 = vector.broadcast %141 : vector<8x1xf32> to vector<8x8xf32>
    %143 = arith.mulf %138, %142 : vector<8x8xf32>
    %cst_49 = arith.constant dense<0.000000e+00> : vector<8x32xf32>
    %144 = tpu.matmul %143, %136, %cst_49 {dimension_numbers = #tpu.dot_dimension_numbers<[1], [0], [0], [1], [0, 0, 1, 1], [], []>} : vector<8x8xf32>, vector<8x32xf32>, vector<8x32xf32> -> vector<8x32xf32>
    %145 = tpu.concatenate %111, %122, %133, %144 in 1 : vector<8x32xf32>, vector<8x32xf32>, vector<8x32xf32>, vector<8x32xf32> -> vector<8x128xf32>
    %146 = arith.truncf %145 : vector<8x128xf32> to vector<8x128xbf16>
    %cst_50 = arith.constant dense<0.000000e+00> : vector<8x128xf32>
    %147 = tpu.matmul %146, %8, %cst_50 {dimension_numbers = #tpu.dot_dimension_numbers<[1], [0], [0], [1], [0, 0, 1, 1], [], []>} : vector<8x128xbf16>, vector<128x128xbf16>, vector<8x128xf32> -> vector<8x128xf32>
    %148 = tpu.concatenate %100, %147 in 0 : vector<8x128xf32>, vector<8x128xf32> -> vector<16x128xf32>
    %149 = arith.addf %15, %148 : vector<16x128xf32>
    %150 = vector.extract_strided_slice %4 {offsets = [7, 0], sizes = [1, 128], strides = [1, 1]} : vector<9x128xf32> to vector<1x128xf32>
    %151 = vector.broadcast %150 : vector<1x128xf32> to vector<16x128xf32>
    %152 = arith.addf %149, %151 : vector<16x128xf32>
    %153 = vector.extract_strided_slice %4 {offsets = [2, 0], sizes = [1, 128], strides = [1, 1]} : vector<9x128xf32> to vector<1x128xf32>
    %154 = vector.extract_strided_slice %4 {offsets = [3, 0], sizes = [1, 128], strides = [1, 1]} : vector<9x128xf32> to vector<1x128xf32>
    %cst_51 = arith.constant dense<0.000000e+00> : vector<16xf32>
    %155 = vector.multi_reduction <add>, %152, %cst_51 [1] : vector<16x128xf32> to vector<16xf32>
    %156 = vector.shape_cast %155 : vector<16xf32> to vector<16x1xf32>
    %cst_52 = arith.constant 1.280000e+02 : f32
    %157 = vector.broadcast %cst_52 : f32 to vector<16x1xf32>
    %158 = arith.divf %156, %157 : vector<16x1xf32>
    %159 = vector.broadcast %158 : vector<16x1xf32> to vector<16x128xf32>
    %160 = arith.subf %152, %159 : vector<16x128xf32>
    %161 = arith.mulf %160, %160 : vector<16x128xf32>
    %cst_53 = arith.constant dense<0.000000e+00> : vector<16xf32>
    %162 = vector.multi_reduction <add>, %161, %cst_53 [1] : vector<16x128xf32> to vector<16xf32>
    %163 = vector.shape_cast %162 : vector<16xf32> to vector<16x1xf32>
    %cst_54 = arith.constant 1.280000e+02 : f32
    %164 = vector.broadcast %cst_54 : f32 to vector<16x1xf32>
    %165 = arith.divf %163, %164 : vector<16x1xf32>
    %166 = vector.broadcast %158 : vector<16x1xf32> to vector<16x128xf32>
    %167 = arith.subf %152, %166 : vector<16x128xf32>
    %cst_55 = arith.constant 9.99999974E-6 : f32
    %168 = vector.broadcast %cst_55 : f32 to vector<16x1xf32>
    %169 = arith.addf %165, %168 : vector<16x1xf32>
    %170 = math.rsqrt %169 : vector<16x1xf32>
    %171 = vector.broadcast %170 : vector<16x1xf32> to vector<16x128xf32>
    %172 = arith.mulf %167, %171 : vector<16x128xf32>
    %173 = vector.broadcast %153 : vector<1x128xf32> to vector<16x128xf32>
    %174 = arith.mulf %172, %173 : vector<16x128xf32>
    %175 = vector.broadcast %154 : vector<1x128xf32> to vector<16x128xf32>
    %176 = arith.addf %174, %175 : vector<16x128xf32>
    %177 = arith.truncf %176 : vector<16x128xf32> to vector<16x128xbf16>
    %cst_56 = arith.constant dense<0.000000e+00> : vector<16x512xf32>
    %178 = tpu.matmul %177, %10, %cst_56 {dimension_numbers = #tpu.dot_dimension_numbers<[1], [0], [0], [1], [0, 0, 1, 1], [], []>} : vector<16x128xbf16>, vector<128x512xbf16>, vector<16x512xf32> -> vector<16x512xf32>
    %179 = vector.broadcast %14 : vector<1x512xf32> to vector<16x512xf32>
    %180 = arith.addf %178, %179 : vector<16x512xf32>
    %cst_57 = arith.constant 5.000000e-01 : f32
    %181 = vector.broadcast %cst_57 : f32 to vector<16x512xf32>
    %182 = arith.mulf %181, %180 : vector<16x512xf32>
    %cst_58 = arith.constant 0.707106769 : f32
    %183 = vector.broadcast %cst_58 : f32 to vector<16x512xf32>
    %184 = arith.mulf %180, %183 : vector<16x512xf32>
    %185 = math.erf %184 : vector<16x512xf32>
    %cst_59 = arith.constant 1.000000e+00 : f32
    %186 = vector.broadcast %cst_59 : f32 to vector<16x512xf32>
    %187 = arith.addf %186, %185 : vector<16x512xf32>
    %188 = arith.mulf %182, %187 : vector<16x512xf32>
    %189 = arith.truncf %188 : vector<16x512xf32> to vector<16x512xbf16>
    %cst_60 = arith.constant dense<0.000000e+00> : vector<16x128xf32>
    %190 = tpu.matmul %189, %12, %cst_60 {dimension_numbers = #tpu.dot_dimension_numbers<[1], [0], [0], [1], [0, 0, 1, 1], [], []>} : vector<16x512xbf16>, vector<512x128xbf16>, vector<16x128xf32> -> vector<16x128xf32>
    %191 = arith.addf %152, %190 : vector<16x128xf32>
    %192 = vector.extract_strided_slice %4 {offsets = [8, 0], sizes = [1, 128], strides = [1, 1]} : vector<9x128xf32> to vector<1x128xf32>
    %193 = vector.broadcast %192 : vector<1x128xf32> to vector<16x128xf32>
    %194 = arith.addf %191, %193 : vector<16x128xf32>
    %c0_61 = arith.constant 0 : index
    %c0_62 = arith.constant 0 : index
    %195 = vector.load %arg14[%c0_61, %c0_62] : memref<16x128xf32, #tpu.memory_space<vmem>>, vector<16x128xf32>
    tpu.vector_store %arg14[%c0_61, %c0_62], %194 {strides = array<i32>} : memref<16x128xf32, #tpu.memory_space<vmem>>, vector<16x128xf32>,
    %c1_i32 = arith.constant 1 : i32
    %196 = arith.cmpi eq, %arg0, %c1_i32 : i32
    %197 = arith.extui %196 : i1 to i32
    %c0_i32_63 = arith.constant 0 : i32
    %198 = arith.cmpi ne, %197, %c0_i32_63 : i32
    scf.if %198 {
      %c0_64 = arith.constant 0 : index
      %c0_65 = arith.constant 0 : index
      %199 = vector.load %arg9[%c0_64, %c0_65] : memref<2x128xf32, #tpu.memory_space<vmem>>, vector<2x128xf32>
      %c0_66 = arith.constant 0 : index
      %c0_67 = arith.constant 0 : index
      %200 = vector.load %arg14[%c0_66, %c0_67] : memref<16x128xf32, #tpu.memory_space<vmem>>, vector<16x128xf32>
      %201 = vector.extract_strided_slice %199 {offsets = [0, 0], sizes = [1, 128], strides = [1, 1]} : vector<2x128xf32> to vector<1x128xf32>
      %202 = vector.extract_strided_slice %199 {offsets = [1, 0], sizes = [1, 128], strides = [1, 1]} : vector<2x128xf32> to vector<1x128xf32>
      %cst_68 = arith.constant dense<0.000000e+00> : vector<16xf32>
      %203 = vector.multi_reduction <add>, %200, %cst_68 [1] : vector<16x128xf32> to vector<16xf32>
      %204 = vector.shape_cast %203 : vector<16xf32> to vector<16x1xf32>
      %cst_69 = arith.constant 1.280000e+02 : f32
      %205 = vector.broadcast %cst_69 : f32 to vector<16x1xf32>
      %206 = arith.divf %204, %205 : vector<16x1xf32>
      %207 = vector.broadcast %206 : vector<16x1xf32> to vector<16x128xf32>
      %208 = arith.subf %200, %207 : vector<16x128xf32>
      %209 = arith.mulf %208, %208 : vector<16x128xf32>
      %cst_70 = arith.constant dense<0.000000e+00> : vector<16xf32>
      %210 = vector.multi_reduction <add>, %209, %cst_70 [1] : vector<16x128xf32> to vector<16xf32>
      %211 = vector.shape_cast %210 : vector<16xf32> to vector<16x1xf32>
      %cst_71 = arith.constant 1.280000e+02 : f32
      %212 = vector.broadcast %cst_71 : f32 to vector<16x1xf32>
      %213 = arith.divf %211, %212 : vector<16x1xf32>
      %214 = vector.broadcast %206 : vector<16x1xf32> to vector<16x128xf32>
      %215 = arith.subf %200, %214 : vector<16x128xf32>
      %cst_72 = arith.constant 9.99999974E-6 : f32
      %216 = vector.broadcast %cst_72 : f32 to vector<16x1xf32>
      %217 = arith.addf %213, %216 : vector<16x1xf32>
      %218 = math.rsqrt %217 : vector<16x1xf32>
      %219 = vector.broadcast %218 : vector<16x1xf32> to vector<16x128xf32>
      %220 = arith.mulf %215, %219 : vector<16x128xf32>
      %221 = vector.broadcast %201 : vector<1x128xf32> to vector<16x128xf32>
      %222 = arith.mulf %220, %221 : vector<16x128xf32>
      %223 = vector.broadcast %202 : vector<1x128xf32> to vector<16x128xf32>
      %224 = arith.addf %222, %223 : vector<16x128xf32>
      %c0_73 = arith.constant 0 : index
      %c0_74 = arith.constant 0 : index
      %225 = vector.load %arg11[%c0_73, %c0_74] : memref<4x64xf32, #tpu.memory_space<vmem>>, vector<4x64xf32>
      %c0_75 = arith.constant 0 : index
      %c0_76 = arith.constant 0 : index
      %226 = vector.load %arg10[%c0_75, %c0_76] : memref<128x64xbf16, #tpu.memory_space<vmem>>, vector<128x64xbf16>
      %227 = arith.truncf %224 : vector<16x128xf32> to vector<16x128xbf16>
      %cst_77 = arith.constant dense<0.000000e+00> : vector<16x64xf32>
      %228 = tpu.matmul %227, %226, %cst_77 {dimension_numbers = #tpu.dot_dimension_numbers<[1], [0], [0], [1], [0, 0, 1, 1], [], []>} : vector<16x128xbf16>, vector<128x64xbf16>, vector<16x64xf32> -> vector<16x64xf32>
      %229 = vector.extract_strided_slice %225 {offsets = [0, 0], sizes = [1, 64], strides = [1, 1]} : vector<4x64xf32> to vector<1x64xf32>
      %230 = vector.broadcast %229 : vector<1x64xf32> to vector<16x64xf32>
      %231 = arith.addf %228, %230 : vector<16x64xf32>
      %cst_78 = arith.constant 5.000000e-01 : f32
      %232 = vector.broadcast %cst_78 : f32 to vector<16x64xf32>
      %233 = arith.mulf %232, %231 : vector<16x64xf32>
      %cst_79 = arith.constant 0.707106769 : f32
      %234 = vector.broadcast %cst_79 : f32 to vector<16x64xf32>
      %235 = arith.mulf %231, %234 : vector<16x64xf32>
      %236 = math.erf %235 : vector<16x64xf32>
      %cst_80 = arith.constant 1.000000e+00 : f32
      %237 = vector.broadcast %cst_80 : f32 to vector<16x64xf32>
      %238 = arith.addf %237, %236 : vector<16x64xf32>
      %239 = arith.mulf %233, %238 : vector<16x64xf32>
      %240 = vector.extract_strided_slice %225 {offsets = [1, 0], sizes = [1, 64], strides = [1, 1]} : vector<4x64xf32> to vector<1x64xf32>
      %241 = vector.extract_strided_slice %225 {offsets = [2, 0], sizes = [1, 64], strides = [1, 1]} : vector<4x64xf32> to vector<1x64xf32>
      %cst_81 = arith.constant dense<0.000000e+00> : vector<16xf32>
      %242 = vector.multi_reduction <add>, %239, %cst_81 [1] : vector<16x64xf32> to vector<16xf32>
      %243 = vector.shape_cast %242 : vector<16xf32> to vector<16x1xf32>
      %cst_82 = arith.constant 6.400000e+01 : f32
      %244 = vector.broadcast %cst_82 : f32 to vector<16x1xf32>
      %245 = arith.divf %243, %244 : vector<16x1xf32>
      %246 = vector.broadcast %245 : vector<16x1xf32> to vector<16x64xf32>
      %247 = arith.subf %239, %246 : vector<16x64xf32>
      %248 = arith.mulf %247, %247 : vector<16x64xf32>
      %cst_83 = arith.constant dense<0.000000e+00> : vector<16xf32>
      %249 = vector.multi_reduction <add>, %248, %cst_83 [1] : vector<16x64xf32> to vector<16xf32>
      %250 = vector.shape_cast %249 : vector<16xf32> to vector<16x1xf32>
      %cst_84 = arith.constant 6.400000e+01 : f32
      %251 = vector.broadcast %cst_84 : f32 to vector<16x1xf32>
      %252 = arith.divf %250, %251 : vector<16x1xf32>
      %253 = vector.broadcast %245 : vector<16x1xf32> to vector<16x64xf32>
      %254 = arith.subf %239, %253 : vector<16x64xf32>
      %cst_85 = arith.constant 9.99999974E-6 : f32
      %255 = vector.broadcast %cst_85 : f32 to vector<16x1xf32>
      %256 = arith.addf %252, %255 : vector<16x1xf32>
      %257 = math.rsqrt %256 : vector<16x1xf32>
      %258 = vector.broadcast %257 : vector<16x1xf32> to vector<16x64xf32>
      %259 = arith.mulf %254, %258 : vector<16x64xf32>
      %260 = vector.broadcast %240 : vector<1x64xf32> to vector<16x64xf32>
      %261 = arith.mulf %259, %260 : vector<16x64xf32>
      %262 = vector.broadcast %241 : vector<1x64xf32> to vector<16x64xf32>
      %263 = arith.addf %261, %262 : vector<16x64xf32>
      %264 = vector.extract_strided_slice %225 {offsets = [3, 0], sizes = [1, 64], strides = [1, 1]} : vector<4x64xf32> to vector<1x64xf32>
      %265 = vector.broadcast %264 : vector<1x64xf32> to vector<16x64xf32>
      %266 = arith.mulf %263, %265 : vector<16x64xf32>
      %cst_86 = arith.constant dense<0.000000e+00> : vector<16xf32>
      %267 = vector.multi_reduction <add>, %266, %cst_86 [1] : vector<16x64xf32> to vector<16xf32>
      %268 = vector.shape_cast %267 : vector<16xf32> to vector<16x1xf32>
      %c0_87 = arith.constant 0 : index
      %c0_88 = arith.constant 0 : index
      %269 = vector.load %arg12[%c0_87, %c0_88] : memref<1x1xf32, #tpu.memory_space<vmem>>, vector<1x1xf32>
      %270 = vector.broadcast %269 : vector<1x1xf32> to vector<16x1xf32>
      %271 = arith.addf %268, %270 : vector<16x1xf32>
      %c0_89 = arith.constant 0 : index
      %c0_90 = arith.constant 0 : index
      %272 = vector.load %arg13[%c0_89, %c0_90] : memref<16x1xf32, #tpu.memory_space<vmem>>, vector<16x1xf32>
      tpu.vector_store %arg13[%c0_89, %c0_90], %271 {strides = array<i32>} : memref<16x1xf32, #tpu.memory_space<vmem>>, vector<16x1xf32>,
    } else {
    }
    return
  }
  func.func @transform_0(%arg0: i32) -> (i32, i32) {
    %c0_i32 = arith.constant 0 : i32
    %c0_i32_0 = arith.constant 0 : i32
    %c0_i32_1 = arith.constant 0 : i32
    return %c0_i32, %c0_i32_0 : i32, i32
  }
  func.func @transform_1(%arg0: i32) -> (i32, i32) {
    %c0_i32 = arith.constant 0 : i32
    %c0_i32_0 = arith.constant 0 : i32
    %c0_i32_1 = arith.constant 0 : i32
    return %c0_i32, %c0_i32_0 : i32, i32
  }
  func.func @transform_2(%arg0: i32) -> (i32, i32, i32) {
    %c0_i32 = arith.constant 0 : i32
    %c0_i32_0 = arith.constant 0 : i32
    %c0_i32_1 = arith.constant 0 : i32
    return %arg0, %c0_i32, %c0_i32_0 : i32, i32, i32
  }
  func.func @transform_3(%arg0: i32) -> (i32, i32, i32) {
    %c0_i32 = arith.constant 0 : i32
    %c0_i32_0 = arith.constant 0 : i32
    %c0_i32_1 = arith.constant 0 : i32
    return %arg0, %c0_i32, %c0_i32_0 : i32, i32, i32
  }
  func.func @transform_4(%arg0: i32) -> (i32, i32, i32) {
    %c0_i32 = arith.constant 0 : i32
    %c0_i32_0 = arith.constant 0 : i32
    %c0_i32_1 = arith.constant 0 : i32
    return %arg0, %c0_i32, %c0_i32_0 : i32, i32, i32
  }
  func.func @transform_5(%arg0: i32) -> (i32, i32, i32) {
    %c0_i32 = arith.constant 0 : i32
    %c0_i32_0 = arith.constant 0 : i32
    %c0_i32_1 = arith.constant 0 : i32
    return %arg0, %c0_i32, %c0_i32_0 : i32, i32, i32
  }
  func.func @transform_6(%arg0: i32) -> (i32, i32, i32) {
    %c0_i32 = arith.constant 0 : i32
    %c0_i32_0 = arith.constant 0 : i32
    %c0_i32_1 = arith.constant 0 : i32
    return %arg0, %c0_i32, %c0_i32_0 : i32, i32, i32
  }
  func.func @transform_7(%arg0: i32) -> (i32, i32, i32) {
    %c0_i32 = arith.constant 0 : i32
    %c0_i32_0 = arith.constant 0 : i32
    %c0_i32_1 = arith.constant 0 : i32
    return %arg0, %c0_i32, %c0_i32_0 : i32, i32, i32
  }
  func.func @transform_8(%arg0: i32) -> (i32, i32) {
    %c0_i32 = arith.constant 0 : i32
    %c0_i32_0 = arith.constant 0 : i32
    %c0_i32_1 = arith.constant 0 : i32
    return %c0_i32, %c0_i32_0 : i32, i32
  }
  func.func @transform_9(%arg0: i32) -> (i32, i32) {
    %c0_i32 = arith.constant 0 : i32
    %c0_i32_0 = arith.constant 0 : i32
    %c0_i32_1 = arith.constant 0 : i32
    return %c0_i32, %c0_i32_0 : i32, i32
  }
  func.func @transform_10(%arg0: i32) -> (i32, i32) {
    %c0_i32 = arith.constant 0 : i32
    %c0_i32_0 = arith.constant 0 : i32
    %c0_i32_1 = arith.constant 0 : i32
    return %c0_i32, %c0_i32_0 : i32, i32
  }
  func.func @transform_11(%arg0: i32) -> (i32, i32) {
    %c0_i32 = arith.constant 0 : i32
    %c0_i32_0 = arith.constant 0 : i32
    %c0_i32_1 = arith.constant 0 : i32
    return %c0_i32, %c0_i32_0 : i32, i32
  }
  func.func @transform_12(%arg0: i32) -> (i32, i32) {
    %c0_i32 = arith.constant 0 : i32
    %c0_i32_0 = arith.constant 0 : i32
    %c0_i32_1 = arith.constant 0 : i32
    return %c0_i32, %c0_i32_0 : i32, i32
  }
}

</mosaic_0001>

<bundles_post_ra>
// kernel: forward.1
= control target key start
LH: loop header
LB: loop body
LE: loop exit
PB: predicated region body
PF: predicated region fallthrough
CT: control target
= control target key end

     0   :  { %s4939_s0 = inlined_call_operand.vmem [shape: f32[16,128], index: 0, kind: input, shape index: {}]   ;;  %s4940_s1 = inlined_call_operand.vmem [shape: f32[16,128], index: 1, kind: input, shape index: {}]   ;;  %s4941_s2 = inlined_call_operand.hbm [shape: bf16[2,128,384], index: 2, kind: input, shape index: {}]   ;;  %s4942_s3 = inlined_call_operand.vmem [shape: bf16[2,128,128], index: 3, kind: input, shape index: {}]   ;;  %s4943_s4 = inlined_call_operand.hbm [shape: bf16[2,128,512], index: 4, kind: input, shape index: {}]   ;;  %s4944_s5 = inlined_call_operand.hbm [shape: bf16[2,512,128], index: 5, kind: input, shape index: {}]   ;;  %s4945_s6 = inlined_call_operand.vmem [shape: f32[2,9,128], index: 6, kind: input, shape index: {}]   ;;  %s4946_s7 = inlined_call_operand.vmem [shape: f32[2,1,512], index: 7, kind: input, shape index: {}]   ;;  %s4947_s8 = inlined_call_operand.vmem [shape: f32[2,128], index: 8, kind: input, shape index: {}]   ;;  %s4948_s9 = inlined_call_operand.vmem [shape: bf16[128,64], index: 9, kind: input, shape index: {}]   ;;  %s4949_s10 = inlined_call_operand.vmem [shape: f32[4,64], index: 10, kind: input, shape index: {}]   ;;  %s4950_s11 = inlined_call_operand.<no memory space> [shape: f32[1,1], index: 11, kind: input, shape index: {}]   ;;  %s4951_s12 = inlined_call_operand.vmem [shape: f32[16,1], index: 12, kind: output, shape index: {}]  }
   0x1   :  { %4959 = sst [smem:[#allocation14_spill]] %s4943_s4  ;;  %v17_v0 = vstv %s4950_s11 }
   0x2   :  { %4960 = sst [smem:[#allocation15_spill]] %s4951_s12  ;;  %18 = vst [vmem:[#allocation3] sm:$0x1] %v17_v0 }
   0x3   :  { %19 = vsyncpa [#allocation5], 0 }
   0x4   :  { %21 = vsyncpa [#allocation5 + $0x1], 0 }
   0x5   :  { %22 = vsyncpa [#allocation7], 0 }
   0x6   :  { %24 = vsyncpa [#allocation7 + $0x1], 0  ;;  %s4315_s23 = smov 0   ;;  %s4317_s24 = smov 0  }
   0x7   :  { %s4319_s25 = smov 0   ;;  %s4321_s26 = smov 0  }
   0x8 LB: > { %4961 = sst [smem:[#allocation11_spill]] %s4224_s25  ;;  %s4334_s11 = sadd.s32 4294967295, %s4228_s26   ;;  %s4228_s26 = sphi %s4321_s26, %s4974_s26   ;;  %s4224_s25 = sphi %s4319_s25, %s4976_s25   ;;  %s4220_s24 = sphi %s4317_s24, %s4978_s24   ;;  %s4216_s23 = sphi %s4315_s23, %s4977_s23  }
   0x9   : > { %s4337_s27 = sadd.s32 1, %s4228_s26   ;;  %s79_s29 = sadd.s32 1, %s4224_s25 }
   0xa   : > { %4962 = sst [smem:[#allocation12_spill]] %s4337_s27  ;;  %s76_s28 = ssub.s32 %s4228_s26, %s4337_s27 }
   0xb   : > { %p77_p0 = scmp.eq.s32.totalorder %s76_s28, 0  ;;  %p86_p1 = scmp.ne.s32.totalorder %s4224_s25, %s4220_s24 }
   0xc   : > { %p87_p2 = scmp.eq.s32.totalorder %s4228_s26, 0  ;;  %p92_p3 = scmp.ne.s32.totalorder %s4220_s24, %s4216_s23 }
   0xd   : > { %s4347_s30 = scalar_select %p77_p0, %s4224_s25, %s79_s29  }
   0xe   : > { %p88_p4 = por %p87_p2, %p86_p1  ;;  %p93_p5 = scmp.eq.s32.totalorder %s4334_s11, 0 }
   0xf   : > { %4963 = sst [smem:[#allocation13_spill]] %s4347_s30  ;;  %p3855_p6 = scmp.lt.s32.totalorder %s4228_s26, 2 }
  0x10   : > { %p4351_p7 = por %p93_p5, %p92_p3  ;;  %s4356_s14 = sand.u32 1, %s4224_s25  }
  0x11   : > { %p4358_p8 = pnand %p3855_p6, %p88_p4  ;;  %s398_s16 = sand.u32 1, %s4228_s26  }
  0x12   : > { %s4964_s13 = scalar_select %p4351_p7, 1, 0 }
  0x13   : > { %s4952_s17 = sshll.u32 %s4356_s14, 8  ;;  %s4953_s18 = sshll.u32 %s4228_s26, 12 }
  0x14   : > { %s402_s19 = scalar_lea.vmem [#allocation6], %s4952_s17  ;;  %s4966_s4 = sld [smem:[#allocation14_spill]] }
  0x15   : > { %s409_s20 = sshll.u32 %s402_s19, 4  ;;  %s4376_s28 = scalar_lea.sflag [#allocation7], %s398_s16  ;;  %s4374_s20 = int_to_ptr.vmem [resolvable:$true] %s409_s20 }
  0x16   : > { %p4382_p10 = pneg %p4358_p8 }
  0x1a   : > { %s4372_s23 = scalar_lea.hbm %s4966_s4, %s4953_s18  ;;  %s4105_s22 = scalar_lea.hbm %s4966_s4, 8192 }
  0x1b   : > { %s4100_s29 = scalar_lea.hbm %s4372_s23, 4096  ;;  %p4106_p13 = scmp.lt.u32.totalorder %s4372_s23, %s4966_s4 }
  0x1c   : > { %p4101_p9 = scmp.ne.s32.totalorder %s4372_s23, %s4100_s29  ;;  %p4107_p0 = scmp.lt.u32.totalorder %s4105_s22, %s4100_s29 }
  0x1d   : > { %p4109_p2 = scmp.lt.u32.totalorder %s4100_s29, %s4372_s23 }
  0x1e   : > { %p4103_p11 = pnand %p4382_p10, %p4101_p9  ;;  %p4108_p1 = por %p4107_p0, %p4106_p13 }
  0x20   : > { %p4104_p12 = pneg %p4103_p11  ;;  %p4110_p3 = por %p4109_p2, %p4108_p1 }
  0x22   : > { %p4111_p4 = pnand %p4110_p3, %p4104_p12 }
  0x24   : > { %4114 = shalt.err (!%p4111_p4)
}
  0x25   : > { %s4115_s16 = scalar_lea.vmem %s4374_s20, 4096  ;;  %s4230_s19 = smov [#allocation6]  }
  0x26   : > { %p4116_p5 = scmp.ne.s32.totalorder %s4374_s20, %s4115_s16  ;;  %s4120_s21 = sshll.u32 %s4230_s19, 4  ;;  %s4121_s21 = int_to_ptr.vmem [resolvable:$false] %s4120_s21 }
  0x27   : > { %s4122_s30 = scalar_lea.vmem %s4121_s21, 8192  ;;  %p4123_p11 = scmp.lt.s32.totalorder %s4374_s20, %s4121_s21 }
  0x28   : > { %p4118_p6 = pnand %p4116_p5, %p4382_p10  ;;  %p4124_p7 = scmp.lt.s32.totalorder %s4122_s30, %s4115_s16 }
  0x2a   : > { %p4119_p9 = pneg %p4118_p6  ;;  %p4125_p13 = por %p4124_p7, %p4123_p11 }
  0x2c   : > { %p4126_p0 = pnand %p4125_p13, %p4119_p9 }
  0x2e   : > { %4129 = shalt.err (!%p4126_p0)
}
  0x2f   : > { %s4231_s18 = smov 256   ;;  %s4232_s29 = smov 16  }
  0x30   : > { %3851 = dma.hbm_to_vmem [thread:$0]  (!%p4358_p8), %s4372_s23, 4096, %s4374_s20, %s4376_s28, %s4231_s18, %s4231_s18, %s4232_s29  }
  0x31   : > { %s4968_s22 = sshll.u32 %s4228_s26, 12  ;;  %s4969_s30 = sshll.u32 %s4356_s14, 8 }
  0x32   : > { %s4411_s21 = scalar_lea.hbm %s4944_s5, %s4968_s22  ;;  %s423_s4 = scalar_lea.vmem [#allocation8], %s4969_s30 }
  0x33   : > { %s430_s25 = sshll.u32 %s423_s4, 4  ;;  %p3418_p7 = scmp.ge.s32.totalorder %s4228_s26, 1  ;;  %s4416_s25 = int_to_ptr.vmem [resolvable:$true] %s430_s25 }
  0x34   : > { %p453_p12 = scmp.lt.s32.totalorder %s4228_s26, 3  ;;  %s3836_s27 = smul.u32 192, %s4356_s14 }
  0x35   : > { %s3837_s20 = smul.u32 3072, %s4228_s26  ;;  %s370_s16 = scalar_lea.sflag [#allocation5], %s4356_s14 }
  0x36   : > { %p4420_p1 = pnand %p3418_p7, %p453_p12  ;;  %s373_s4 = scalar_lea.vmem [#allocation4], %s3836_s27 }
  0x37   : > { %s4428_s29 = scalar_lea.hbm %s4941_s2, %s3837_s20  ;;  %s380_s22 = sshll.u32 %s373_s4, 4  ;;  %s4430_s22 = int_to_ptr.vmem [resolvable:$true] %s380_s22 }
  0x38   : > { %s4970_s12 = scalar_select %p4420_p1, 1, 0 }
  0x39   : > { %s4130_s19 = scalar_lea.hbm %s4428_s29, 3072  ;;  %s4135_s23 = scalar_lea.hbm %s4941_s2, 6144 }
  0x3a   : > { %p4131_p2 = scmp.ne.s32.totalorder %s4428_s29, %s4130_s19  ;;  %p4136_p5 = scmp.lt.u32.totalorder %s4428_s29, %s4941_s2 }
  0x3b   : > { %p4137_p6 = scmp.lt.u32.totalorder %s4135_s23, %s4130_s19  ;;  %p4139_p11 = scmp.lt.u32.totalorder %s4130_s19, %s4428_s29 }
  0x3c   : > { %p4133_p3 = pnand %p4131_p2, %p4382_p10 }
  0x3d   : > { %p4138_p9 = por %p4137_p6, %p4136_p5 }
  0x3e   : > { %p4134_p4 = pneg %p4133_p3 }
  0x3f   : > { %p4140_p13 = por %p4139_p11, %p4138_p9 }
  0x41   : > { %p4141_p0 = pnand %p4140_p13, %p4134_p4 }
  0x43   : > { %4144 = shalt.err (!%p4141_p0)
}
  0x44   : > { %s4145_s27 = scalar_lea.vmem %s4430_s22, 3072  ;;  %s4233_s4 = smov [#allocation4]  }
  0x45   : > { %p4146_p7 = scmp.ne.s32.totalorder %s4430_s22, %s4145_s27  ;;  %s4150_s26 = sshll.u32 %s4233_s4, 4  ;;  %s4151_s26 = int_to_ptr.vmem [resolvable:$false] %s4150_s26 }
  0x46   : > { %s4152_s30 = scalar_lea.vmem %s4151_s26, 6144  ;;  %p4153_p3 = scmp.lt.s32.totalorder %s4430_s22, %s4151_s26 }
  0x47   : > { %p4148_p12 = pnand %p4146_p7, %p4382_p10  ;;  %p4154_p1 = scmp.lt.s32.totalorder %s4152_s30, %s4145_s27 }
  0x49   : > { %p4149_p2 = pneg %p4148_p12  ;;  %p4155_p5 = por %p4154_p1, %p4153_p3 }
  0x4b   : > { %p4156_p6 = pnand %p4155_p5, %p4149_p2 }
  0x4d   : > { %4159 = shalt.err (!%p4156_p6)
}
  0x4e   : > { %s4234_s19 = smov 192   ;;  %s4235_s23 = smov 12  }
  0x4f   : > { %3848 = dma.hbm_to_vmem [thread:$0]  (!%p4358_p8), %s4428_s29, 3072, %s4430_s22, %s370_s16, %s4234_s19, %s4234_s19, %s4235_s23  }
  0x50   : > { %s4160_s20 = scalar_lea.hbm %s4411_s21, 4096  ;;  %s4165_s4 = scalar_lea.hbm %s4944_s5, 8192 }
  0x51   : > { %p4161_p4 = scmp.ne.s32.totalorder %s4411_s21, %s4160_s20  ;;  %p4166_p11 = scmp.lt.u32.totalorder %s4411_s21, %s4944_s5 }
  0x52   : > { %p4167_p13 = scmp.lt.u32.totalorder %s4165_s4, %s4160_s20  ;;  %p4169_p7 = scmp.lt.u32.totalorder %s4160_s20, %s4411_s21 }
  0x53   : > { %p4163_p1 = pnand %p4161_p4, %p4382_p10 }
  0x54   : > { %p4168_p0 = por %p4167_p13, %p4166_p11 }
  0x55   : > { %p4164_p9 = pneg %p4163_p1 }
  0x56   : > { %p4170_p12 = por %p4169_p7, %p4168_p0 }
  0x58   : > { %p4171_p2 = pnand %p4170_p12, %p4164_p9 }
  0x5a   : > { %4174 = shalt.err (!%p4171_p2)
}
  0x5b   : > { %s4175_s14 = scalar_lea.vmem %s4416_s25, 4096  ;;  %s4236_s29 = smov [#allocation8]  }
  0x5c   : > { %p4176_p3 = scmp.ne.s32.totalorder %s4416_s25, %s4175_s14  ;;  %s4180_s22 = sshll.u32 %s4236_s29, 4  ;;  %s4181_s22 = int_to_ptr.vmem [resolvable:$false] %s4180_s22 }
  0x5d   : > { %s4182_s16 = scalar_lea.vmem %s4181_s22, 8192  ;;  %p4183_p4 = scmp.lt.s32.totalorder %s4416_s25, %s4181_s22 }
  0x5e   : > { %p4178_p5 = pnand %p4176_p3, %p4382_p10  ;;  %p4184_p1 = scmp.lt.s32.totalorder %s4182_s16, %s4175_s14 }
  0x60   : > { %p4179_p6 = pneg %p4178_p5  ;;  %p4185_p11 = por %p4184_p1, %p4183_p4 }
  0x62   : > { %p4186_p13 = pnand %p4185_p11, %p4179_p6 }
  0x64   : > { %4189 = shalt.err (!%p4186_p13)
}
  0x65   : > { %s4237_s19 = smov 64   ;;  %s4238_s23 = smov 4  }
  0x66   : > { %3854 = dma.hbm_to_vmem [thread:$0]  (!%p4358_p8), %s4411_s21, 4096, %s4416_s25, %s4376_s28, %s4237_s19, %s4237_s19, %s4238_s23  }
  0x67   : > { %p4971_p10 = scmp.ne.s32.totalorder %s4970_s12, 0 }
  0x68   : > { %s459_s17 = sand.u32 (!%p4971_p10), 1, %s4220_s24   ;;  %p4972_p9 = scmp.ne.s32.totalorder (!%p4971_p10), %s4964_s13, 0 }
  0x69   : > { %457 = sbr.rel (%p4971_p10) target bundleno = 6082 (0x17c2), region = 68  ;;  %s460_s18 = scalar_lea.sflag (!%p4971_p10), [#allocation5], %s459_s17 }
  0x6a   : > { %s3838_s20 = smul.u32 (!%p4971_p10), 192, %s459_s17 }
  0x6c   : > { %s4481_s27 = scalar_lea.vmem (!%p4971_p10), [#allocation4], %s3838_s20 }
  0x70   : > { %4207 = dma.done.wait (%p4972_p9), %s460_s18, 3072  }
  0x71   : > { %4209 = vsyncadd (%p4972_p9), %s460_s18, 4294964224  ;;  %s468_s4 = sand.u32 1, %s4334_s11   ;;  %s3419_s15 = sshll.u32 %s459_s17, 8 }
  0x72   : > { %s469_s25 = scalar_lea.sflag [#allocation7], %s468_s4  ;;  %s4488_s28 = scalar_lea.vmem [#allocation6], %s3419_s15 }
  0x73   : > { %4211 = dma.done.wait (%p4972_p9), %s469_s25, 8192  }
  0x74   : > { %4213 = vsyncadd (%p4972_p9), %s469_s25, 4294959104  ;;  %p541_p8 = scmp.lt.s32.totalorder %s4334_s11, 1  ;;  %s4511_s18 = scalar_lea.vmem [#allocation8], %s3419_s15 }
  0x75   : > { %p3426_p0 = scmp.ne.s32.totalorder %s4334_s11, 0 }
  0x76   : > { %s542_s12 = scalar_select %p541_p8, %s4334_s11, 1 }
  0x77   : > { %559 = sbr.rel (%p3426_p0) target bundleno = 126 (0x7e), region = 84  ;;  %v560_v1 = vld [vmem:[%s4939_s0] sm:$0xff] (!%p3426_p0)  ;;  %v561_v3 = vld [vmem:[%s4939_s0 + $0x8] sm:$0xff] (!%p3426_p0) }
  0x78   : > { %s3562_s21 = sshll.u32 %s542_s12, 6  ;;  %s3563_s26 = sshll.u32 %s542_s12, 4  ;;  %v562_v2 = vld [vmem:[%s4940_s1] sm:$0xff] (!%p3426_p0)  ;;  %v563_v5 = vld [vmem:[%s4940_s1 + $0x8] sm:$0xff] (!%p3426_p0) }
  0x79   : > { %s4499_s29 = scalar_lea.vmem %s4942_s3, %s3562_s21  ;;  %s4504_s19 = scalar_lea.vmem %s4945_s6, %s3563_s26  ;;  %v564_v4 = vadd.f32 (!%p3426_p0), %v562_v2, %v560_v1  ;;  %v565_v6 = vadd.f32 (!%p3426_p0), %v563_v5, %v561_v3 }
  0x7a   : > { %s3425_s23 = sshll.u32 %s542_s12, 2 }
  0x7b   : > { %s4509_s20 = scalar_lea.vmem %s4946_s7, %s3425_s23  ;;  %566 = vst [vmem:[#allocation2] sm:$0xff] (!%p3426_p0), %v564_v4  ;;  %567 = vst [vmem:[#allocation2 + $0x8] sm:$0xff] (!%p3426_p0), %v565_v6 }
  0x7e PF: > { %v3902_v9 = vld [vmem:[%s4481_s27 + $0x4] ss:$12 sps:$4 sm:$0xff]   ;;  %v3904_v10 = vld [vmem:[%s4481_s27] ss:$12 sps:$4 sm:$0xff]   ;;  %v4239_v11 = vmov 0.0   ;;  %v4240_v37 = vmov 0   ;;  %v740_v47 = vlaneseq }
  0x7f   : > { %3676 = vmatprep.subr.bf16.mxu1 %v4239_v11  ;;  %v3905_v12 = vld [vmem:[%s4481_s27 + $0x8] ss:$12 sps:$4 sm:$0xff]   ;;  %881 = vmatprep.subr.bf16.mxu0 %v3902_v9  ;;  %v3908_v22 = vld [vmem:[%s4481_s27 + $0x18] ss:$12 sps:$4 sm:$0xff]   ;;  %v3909_v23 = vld [vmem:[%s4481_s27 + $0x20] ss:$12 sps:$4 sm:$0xff]  }
  0x80   : > { %882 = vmatpush1.bf16.msra.mxu0 %v3904_v10  ;;  %3677 = vmatpush3.bf16.msra.mxu1 %v3905_v12  ;;  %v3906_v21 = vld [vmem:[%s4481_s27 + $0x1c] ss:$12 sps:$4 sm:$0xff]   ;;  %v3910_v24 = vld [vmem:[%s4481_s27 + $0x34] ss:$12 sps:$4 sm:$0xff]   ;;  %v3913_v26 = vld [vmem:[%s4481_s27 + $0x38] ss:$12 sps:$4 sm:$0xff]  }
  0x81   : > { %3678 = vmatprep.subr.bf16.mxu1 %v4239_v11  ;;  %883 = vmatprep.subr.bf16.mxu0 %v3906_v21  ;;  %v3912_v25 = vld [vmem:[%s4481_s27 + $0x30] ss:$12 sps:$4 sm:$0xff]   ;;  %v3914_v27 = vld [vmem:[%s4481_s27 + $0x4c] ss:$12 sps:$4 sm:$0xff]   ;;  %v3916_v28 = vld [vmem:[%s4481_s27 + $0x48] ss:$12 sps:$4 sm:$0xff]  }
  0x82   : > { %v715_v7 = vld [vmem:[#allocation2] sm:$0xff]  ;;  %v716_v8 = vld [vmem:[#allocation2 + $0x8] sm:$0xff]  ;;  %913 = vmatprep.mubr.bf16.mxu0 %v4240_v37  ;;  %vm4241_vm0 = vmmov 0   ;;  %v4571_v50 = vshrl.u32 %v740_v47, 7  ;;  %vm983_vm1 = vcmask 261120   ;;  %vm1062_vm2 = vcmask 64512  }
  0x83   : > { %717 = vadd.xlane.f32.xlu0 %v715_v7  ;;  %v3917_v29 = vld [vmem:[%s4481_s27 + $0x50] ss:$12 sps:$4 sm:$0xff]   ;;  %v3920_v31 = vld [vmem:[%s4481_s27 + $0x60] ss:$12 sps:$4 sm:$0xff]   ;;  %v3921_v32 = vld [vmem:[%s4481_s27 + $0x68] ss:$12 sps:$4 sm:$0xff]   ;;  %3692 = vmatprep.mubr.msk.bf16.mxu1 %vm4241_vm0, %v4239_v11 }
  0x84   : > { %884 = vmatpush1.bf16.msra.mxu0 %v3908_v22  ;;  %3679 = vmatpush3.bf16.msra.mxu1 %v3909_v23  ;;  %v3918_v30 = vld [vmem:[%s4481_s27 + $0x64] ss:$12 sps:$4 sm:$0xff]   ;;  %v3922_v33 = vld [vmem:[%s4481_s27 + $0x7c] ss:$12 sps:$4 sm:$0xff]   ;;  %v3925_v35 = vld [vmem:[%s4481_s27 + $0x80] ss:$12 sps:$4 sm:$0xff]  }
  0x85   : > { %3680 = vmatprep.subr.bf16.mxu1 %v4239_v11  ;;  %885 = vmatprep.subr.bf16.mxu0 %v3910_v24  ;;  %v3924_v34 = vld [vmem:[%s4481_s27 + $0x78] ss:$12 sps:$4 sm:$0xff]   ;;  %v3926_v36 = vld [vmem:[%s4481_s27 + $0x94] ss:$12 sps:$4 sm:$0xff]   ;;  %v3928_v38 = vld [vmem:[%s4481_s27 + $0x90] ss:$12 sps:$4 sm:$0xff]  }
  0x86   : > { %v3929_v39 = vld [vmem:[%s4481_s27 + $0x98] ss:$12 sps:$4 sm:$0xff]   ;;  %v3932_v41 = vld [vmem:[%s4481_s27 + $0xa8] ss:$12 sps:$4 sm:$0xff]   ;;  %v3933_v42 = vld [vmem:[%s4481_s27 + $0xb0] ss:$12 sps:$4 sm:$0xff]  }
  0x87   : > { %719 = vadd.xlane.f32.xlu0 %v716_v8  ;;  %v3930_v40 = vld [vmem:[%s4481_s27 + $0xac] ss:$12 sps:$4 sm:$0xff]   ;;  %v4574_v51 = vsub.s32 0, %v4571_v50  ;;  %v4583_v56 = vsub.s32 1, %v4571_v50  ;;  %v973_v1 = vsub.s32 5, %v4571_v50  ;;  %v967_v2 = vsub.s32 4, %v4571_v50 }
  0x88   : > { %886 = vmatpush1.bf16.msra.mxu0 %v3912_v25  ;;  %3681 = vmatpush3.bf16.msra.mxu1 %v3913_v26  ;;  %v4577_v52 = vld [vmem:[%s4504_s19] sm:$0xff]  ;;  %v979_v3 = vsub.s32 6, %v4571_v50  ;;  %s4242_s27 = smov 96   ;;  %s4243_s15 = smov 64   ;;  %vm1638_vm3 = vcmask 523264   ;;  %vm1640_vm4 = vcmask 785408  }
  0x89   : > { %3682 = vmatprep.subr.bf16.mxu1 %v4239_v11  ;;  %887 = vmatprep.subr.bf16.mxu0 %v3914_v27  ;;  %v743_v55 = vrot.slane %v4577_v52, %v4574_v51  ;;  %v749_v60 = vrot.slane %v4577_v52, %v4583_v56  ;;  %v974_v4 = vrot.slane %v4577_v52, %v973_v1  ;;  %s4244_s16 = smov 32   ;;  %p3548_p7 = scmp.ne.s32.totalorder %s4334_s11, 1 }
  0x8a   : > { %vm4246_vm5 = vmmov (!%p3548_p7), 0   ;;  %vm3287_vm6 = vcmask (!%p3548_p7), 7168   ;;  %s4973_s11 = sld [smem:[#allocation15_spill]] (!%p3548_p7) }
  0x8c   : > { %888 = vmatpush1.bf16.msra.mxu0 %v3916_v28  ;;  %3683 = vmatpush3.bf16.msra.mxu1 %v3917_v29 }
  0x8d   : > { %3684 = vmatprep.subr.bf16.mxu1 %v4239_v11  ;;  %889 = vmatprep.subr.bf16.mxu0 %v3918_v30 }
  0x90   : > { %890 = vmatpush1.bf16.msra.mxu0 %v3920_v31  ;;  %3685 = vmatpush3.bf16.msra.mxu1 %v3921_v32 }
  0x91   : > { %891 = vmatprep.subr.bf16.mxu0 %v3922_v33  ;;  %3686 = vmatprep.subr.bf16.mxu1 %v4239_v11 }
  0x94   : > { %892 = vmatpush1.bf16.msra.mxu0 %v3924_v34  ;;  %3687 = vmatpush3.bf16.msra.mxu1 %v3925_v35 }
  0x95   : > { %893 = vmatprep.subr.bf16.mxu0 %v3926_v36  ;;  %3688 = vmatprep.subr.bf16.mxu1 %v4239_v11 }
  0x98   : > { %894 = vmatpush1.bf16.msra.mxu0 %v3928_v38  ;;  %3689 = vmatpush3.bf16.msra.mxu1 %v3929_v39 }
  0x99   : > { %895 = vmatprep.subr.bf16.mxu0 %v3930_v40  ;;  %3690 = vmatprep.subr.bf16.mxu1 %v4239_v11 }
  0x9c   : > { %896 = vmatpush1.bf16.msra.mxu0 %v3932_v41  ;;  %3691 = vmatpush3.bf16.msra.mxu1 %v3933_v42 }
  0x9d   : > { %3696 = vmatprep.subr.mxu1 %v4239_v11  ;;  %3736 = vmatprep.subr.bf16.mxu0 %v4239_v11 }
 0x110   : > { %v718_v13 = vpop.xlane.xlu0 %717 }
 0x111   : > { %v722_v14 = vmul.f32 0.0078125, %v718_v13 }
 0x113   : > { %v4531_v15 = vsub.f32 %v715_v7, %v722_v14  ;;  %v968_v7 = vrot.slane %v4577_v52, %v967_v2 }
 0x114   : > { %v720_v16 = vpop.xlane.xlu0 %719 }
 0x115   : > { %v723_v17 = vmul.f32 0.0078125, %v720_v16  ;;  %v726_v18 = vmul.f32 %v4531_v15, %v4531_v15 }
 0x117   : > { %v4535_v19 = vsub.f32 %v716_v8, %v723_v17  ;;  %728 = vadd.xlane.f32.xlu1 %v726_v18  ;;  %v980_v8 = vrot.slane %v4577_v52, %v979_v3 }
 0x119   : > { %v727_v20 = vmul.f32 %v4535_v19, %v4535_v19 }
 0x11b   : > { %730 = vadd.xlane.f32.xlu1 %v727_v20 }
 0x1a4   : > { %v729_v43 = vpop.xlane.xlu1 %728 }
 0x1a5   : > { %v732_v44 = vmul.f32 0.0078125, %v729_v43 }
 0x1a7   : > { %v734_v45 = vadd.f32 1e-05, %v732_v44 }
 0x1a8   : > { %v731_v46 = vpop.xlane.xlu1 %730 }
 0x1a9   : > { %4022 = vrsqrt.f32 %v734_v45  ;;  %v733_v48 = vmul.f32 0.0078125, %v731_v46 }
 0x1ab   : > { %v735_v49 = vadd.f32 1e-05, %v733_v48 }
 0x1ad   : > { %4024 = vrsqrt.f32 %v735_v49 }
 0x1b3   : > { %v4023_v53 = vpop.eup %4022 }
 0x1b4   : > { %v738_v54 = vmul.f32 %v4023_v53, %v4531_v15 }
 0x1b6   : > { %v744_v59 = vmul.f32 %v743_v55, %v738_v54 }
 0x1b7   : > { %v4025_v57 = vpop.eup %4024 }
 0x1b8   : > { %v739_v58 = vmul.f32 %v4025_v57, %v4535_v19  ;;  %v750_v62 = vadd.f32 %v749_v60, %v744_v59 }
 0x1ba   : > { %v745_v61 = vmul.f32 %v743_v55, %v739_v58 }
 0x1bc   : > { %v751_v63 = vadd.f32 %v749_v60, %v745_v61 }
 0x1be   : > { %v752_v0 = vpack.c.bf16 %v751_v63, %v750_v62 }
 0x1c0   : > { %914 = vmatmul.mubr.bf16.vlgmr.msra.gmra.mrb[0].mxu0 %v752_v0  ;;  %3693 = vmatmul.mubr.bf16.vlgmr.msra.gmra.mrb[0].mxu1 %v752_v0 }
 0x1c1   : > { %3698 = vmatprep.mubr.msk.f32.mxu1 %vm4241_vm0, %v4239_v11  ;;  %3752 = vmatprep.mubr.msk.bf16.mxu0 %vm4241_vm0, %v4239_v11 }
 0x293   : > { %v915_v5 = vpop.f32.mrb[0].mxu0  ;;  %v958_v6 = vpop.f32.mrb[0].mxu1 }
 0x294   : > { %v917_v9 = vpop.f32.mrb[1].mxu0  ;;  %v3694_v10 = vpop.f32.mrb[1].mxu1  ;;  %v969_v20 = vadd.f32 %v968_v7, %v915_v5  ;;  %v4611_v21 = vadd.f32 %v980_v8, %v958_v6 }
 0x295   : > { %v4598_v12 = vadd.f32 %v974_v4, %v917_v9  ;;  %v919_v13 = vpop.f32.mrb[2].mxu0  ;;  %v961_v14 = vpop.f32.mrb[2].mxu1 }
 0x296   : > { %v4600_v15 = vadd.f32 %v968_v7, %v919_v13  ;;  %v4602_v16 = vadd.f32 %v980_v8, %v961_v14  ;;  %v921_v17 = vpop.f32.mrb[3].mxu0  ;;  %v3695_v18 = vpop.f32.mrb[3].mxu1 }
 0x297   : > { %v4604_v19 = vadd.f32 %v974_v4, %v921_v17  ;;  %1143 = vrot.lane.b32.xlu1 %v4598_v12, %s4242_s27  ;;  %3697 = vmatpush3.xpose.msk.msra.mxu1 %vm983_vm1, %v4598_v12 }
 0x298   : > { %3701 = vmatprep.subr.mxu1 %v4239_v11 }
 0x29a   : > { %3699 = vmatmul.mubr.msk.f32.vlgmr.msra.gmra.mrb[4].mxu1 %vm983_vm1, %v969_v20 }
 0x29b   : > { %3702 = vmatpush3.msra.mxu1 %v4611_v21  ;;  %3703 = vmatprep.mubr.msk.f32.mxu1 %vm4241_vm0, %v4239_v11 }
 0x29c   : > { %3706 = vmatprep.subr.mxu1 %v4239_v11 }
 0x309   : > { %v1144_v31 = vpop.permute.xlu1 %1143 }
 0x36d   : > { %v1056_v22 = vpop.f32.mrb[4].mxu1 }
 0x36e   : > { %v1060_v23 = vmul.f32 1.442695, %v1056_v22  ;;  %v3700_v24 = vpop.f32.mrb[5].mxu1 }
 0x370   : > { %4026 = vpow2.f32 %v1060_v23 }
 0x37a   : > { %v4027_v25 = vpop.eup %4026 }
 0x37b   : > { %v1063_v26 = vsel %vm1062_vm2, %v4027_v25, 0.0 }
 0x37c   : > { %1064 = vadd.xlane.f32.xlu0 %v1063_v26 }
 0x392   : > { %1141 = vrot.lane.b32.xlu0 %v969_v20, %s4242_s27 }
 0x396   : > { %1227 = vrot.lane.b32.xlu0 %v4611_v21, %s4242_s27 }
 0x39a   : > { %1305 = vrot.lane.b32.xlu0 %v4598_v12, %s4243_s15 }
 0x39e   : > { %1303 = vrot.lane.b32.xlu0 %v969_v20, %s4243_s15 }
 0x409   : > { %v1065_v27 = vpop.xlane.xlu0 %1064 }
 0x40a   : > { %4028 = vrcp.f32 %v1065_v27 }
 0x40d   : > { %v1142_v30 = vpop.permute.xlu0 %1141 }
 0x411   : > { %v1228_v32 = vpop.permute.xlu0 %1227 }
 0x414   : > { %v4029_v28 = vpop.eup %4028 }
 0x415   : > { %v1067_v29 = vmul.f32 %v4029_v28, %v4027_v25  ;;  %v1306_v43 = vpop.permute.xlu0 %1305 }
 0x417   : > { %3704 = vmatmul.mubr.msk.f32.vlgmr.msra.gmra.mrb[6].mxu1 %vm1062_vm2, %v1067_v29 }
 0x418   : > { %3707 = vmatpush3.xpose.msk.msra.mxu1 %vm983_vm1, %v1144_v31  ;;  %3708 = vmatprep.mubr.msk.f32.mxu1 %vm4241_vm0, %v4239_v11 }
 0x419   : > { %3711 = vmatprep.subr.mxu1 %v4239_v11  ;;  %v1304_v45 = vpop.permute.xlu0 %1303 }
 0x41b   : > { %3709 = vmatmul.mubr.msk.f32.vlgmr.msra.gmra.mrb[8].mxu1 %vm983_vm1, %v1142_v30 }
 0x41c   : > { %3712 = vmatpush3.msra.mxu1 %v1228_v32  ;;  %3713 = vmatprep.mubr.msk.f32.mxu1 %vm4241_vm0, %v4239_v11 }
 0x41d   : > { %3716 = vmatprep.subr.mxu1 %v4239_v11 }
 0x4ea   : > { %v4634_v33 = vpop.f32.mrb[6].mxu1 }
 0x4eb   : > { %v3705_v34 = vpop.f32.mrb[7].mxu1 }
 0x4ee   : > { %v1215_v35 = vpop.f32.mrb[8].mxu1 }
 0x4ef   : > { %v1219_v36 = vmul.f32 1.442695, %v1215_v35  ;;  %v3710_v38 = vpop.f32.mrb[9].mxu1 }
 0x4f1   : > { %4030 = vpow2.f32 %v1219_v36 }
 0x4fb   : > { %v4031_v39 = vpop.eup %4030 }
 0x4fc   : > { %v1221_v40 = vsel %vm1062_vm2, %v4031_v39, 0.0 }
 0x4fd   : > { %1222 = vadd.xlane.f32.xlu1 %v1221_v40 }
 0x50e   : > { %1388 = vrot.lane.b32.xlu1 %v4611_v21, %s4243_s15 }
 0x512   : > { %1464 = vrot.lane.b32.xlu1 %v969_v20, %s4244_s16 }
 0x58a   : > { %v1223_v41 = vpop.xlane.xlu1 %1222 }
 0x58b   : > { %4032 = vrcp.f32 %v1223_v41  ;;  %v3935_v41 = vld [vmem:[%s4499_s29 + $0x8] sm:$0xff]  }
 0x58e   : > { %v1389_v46 = vpop.permute.xlu1 %1388 }
 0x592   : > { %v1465_v62 = vpop.permute.xlu1 %1464 }
 0x595   : > { %v4033_v42 = vpop.eup %4032 }
 0x596   : > { %v1225_v44 = vmul.f32 %v4033_v42, %v4031_v39  ;;  %v3936_v42 = vld [vmem:[%s4499_s29 + $0x10] sm:$0xff]  }
 0x598   : > { %3714 = vmatmul.mubr.msk.f32.vlgmr.msra.gmra.mrb[10].mxu1 %vm1062_vm2, %v1225_v44 }
 0x599   : > { %3717 = vmatpush3.xpose.msk.msra.mxu1 %vm983_vm1, %v1306_v43  ;;  %3718 = vmatprep.mubr.msk.f32.mxu1 %vm4241_vm0, %v4239_v11 }
 0x59a   : > { %3721 = vmatprep.subr.mxu1 %v4239_v11 }
 0x59c   : > { %3719 = vmatmul.mubr.msk.f32.vlgmr.msra.gmra.mrb[12].mxu1 %vm983_vm1, %v1304_v45 }
 0x59d   : > { %3722 = vmatpush3.msra.mxu1 %v1389_v46  ;;  %3723 = vmatprep.mubr.msk.f32.mxu1 %vm4241_vm0, %v4239_v11 }
 0x59e   : > { %3726 = vmatprep.subr.mxu1 %v4239_v11 }
 0x66b   : > { %v4649_v47 = vpop.f32.mrb[10].mxu1 }
 0x66c   : > { %v3715_v48 = vpop.f32.mrb[11].mxu1 }
 0x66f   : > { %v1377_v49 = vpop.f32.mrb[12].mxu1 }
 0x670   : > { %v1381_v53 = vmul.f32 1.442695, %v1377_v49  ;;  %v3720_v54 = vpop.f32.mrb[13].mxu1 }
 0x671   : > { %v3937_v54 = vld [vmem:[%s4499_s29 + $0x18] sm:$0xff]  }
 0x672   : > { %4034 = vpow2.f32 %v1381_v53 }
 0x67c   : > { %v4035_v55 = vpop.eup %4034 }
 0x67d   : > { %v1383_v57 = vsel %vm1062_vm2, %v4035_v55, 0.0 }
 0x67e   : > { %1384 = vadd.xlane.f32.xlu0 %v1383_v57  ;;  %v3939_v57 = vld [vmem:[%s4499_s29 + $0x28] sm:$0xff]  }
 0x694   : > { %1466 = vrot.lane.b32.xlu0 %v4598_v12, %s4244_s16 }
 0x698   : > { %1549 = vrot.lane.b32.xlu0 %v4611_v21, %s4244_s16 }
 0x70b   : > { %v1385_v58 = vpop.xlane.xlu0 %1384 }
 0x70c   : > { %4036 = vrcp.f32 %v1385_v58  ;;  %v3940_v58 = vld [vmem:[%s4499_s29 + $0x30] sm:$0xff]  }
 0x70f   : > { %v1467_v61 = vpop.permute.xlu0 %1466 }
 0x713   : > { %v1550_v63 = vpop.permute.xlu0 %1549 }
 0x716   : > { %v4037_v59 = vpop.eup %4036 }
 0x717   : > { %v1387_v60 = vmul.f32 %v4037_v59, %v4035_v55  ;;  %v3938_v55 = vld [vmem:[%s4499_s29 + $0x20] sm:$0xff]   ;;  %v3941_v59 = vld [vmem:[%s4499_s29 + $0x38] sm:$0xff]  }
 0x719   : > { %3724 = vmatmul.mubr.msk.f32.vlgmr.msra.gmra.mrb[14].mxu1 %vm1062_vm2, %v1387_v60 }
 0x71a   : > { %3727 = vmatpush3.xpose.msk.msra.mxu1 %vm983_vm1, %v1467_v61  ;;  %3728 = vmatprep.mubr.msk.f32.mxu1 %vm4241_vm0, %v4239_v11 }
 0x71b   : > { %3731 = vmatprep.subr.mxu1 %v4239_v11 }
 0x71d   : > { %3729 = vmatmul.mubr.msk.f32.vlgmr.msra.gmra.mrb[16].mxu1 %vm983_vm1, %v1465_v62 }
 0x71e   : > { %3732 = vmatpush3.msra.mxu1 %v1550_v63  ;;  %3733 = vmatprep.mubr.msk.f32.mxu1 %vm4241_vm0, %v4239_v11 }
 0x71f   : > { %3756 = vmatprep.subr.mxu1 %v4239_v11 }
 0x7ec   : > { %v4665_v0 = vpop.f32.mrb[14].mxu1 }
 0x7ed   : > { %v3725_v1 = vpop.f32.mrb[15].mxu1 }
 0x7f0   : > { %v1538_v2 = vpop.f32.mrb[16].mxu1 }
 0x7f1   : > { %v1542_v3 = vmul.f32 1.442695, %v1538_v2  ;;  %v3730_v4 = vpop.f32.mrb[17].mxu1 }
 0x7f3   : > { %4038 = vpow2.f32 %v1542_v3 }
 0x7fd   : > { %v4039_v5 = vpop.eup %4038 }
 0x7fe   : > { %v1544_v6 = vsel %vm1062_vm2, %v4039_v5, 0.0 }
 0x7ff   : > { %1545 = vadd.xlane.f32.xlu1 %v1544_v6 }
 0x810   : > { %1889 = vrot.lane.b32.xlu1 %v4604_v19, %s4242_s27 }
 0x88c   : > { %v1546_v7 = vpop.xlane.xlu1 %1545 }
 0x88d   : > { %4040 = vrcp.f32 %v1546_v7 }
 0x890   : > { %v1890_v25 = vpop.permute.xlu1 %1889 }
 0x897   : > { %v4041_v8 = vpop.eup %4040 }
 0x898   : > { %v1548_v9 = vmul.f32 %v4041_v8, %v4039_v5 }
 0x89a   : > { %3734 = vmatmul.mubr.msk.f32.vlgmr.msra.gmra.mrb[18].mxu1 %vm1062_vm2, %v1548_v9 }
 0x89b   : > { %3757 = vmatpush3.xpose.msk.msra.mxu1 %vm983_vm1, %v4604_v19  ;;  %3758 = vmatprep.mubr.msk.f32.mxu1 %vm4241_vm0, %v4239_v11 }
 0x89c   : > { %3761 = vmatprep.subr.mxu1 %v4239_v11 }
 0x89e   : > { %3759 = vmatmul.mubr.msk.f32.vlgmr.msra.gmra.mrb[20].mxu1 %vm983_vm1, %v4600_v15 }
 0x89f   : > { %3762 = vmatpush3.msra.mxu1 %v4602_v16  ;;  %3763 = vmatprep.mubr.msk.f32.mxu1 %vm4241_vm0, %v4239_v11 }
 0x8a0   : > { %3766 = vmatprep.subr.mxu1 %v4239_v11 }
 0x96d   : > { %v4682_v10 = vpop.f32.mrb[18].mxu1 }
 0x96e   : > { %v3735_v12 = vpop.f32.mrb[19].mxu1 }
 0x971   : > { %v1803_v13 = vpop.f32.mrb[20].mxu1 }
 0x972   : > { %v1807_v14 = vmul.f32 1.442695, %v1803_v13  ;;  %v3760_v17 = vpop.f32.mrb[21].mxu1 }
 0x974   : > { %4042 = vpow2.f32 %v1807_v14 }
 0x97e   : > { %v4043_v18 = vpop.eup %4042 }
 0x97f   : > { %v1809_v20 = vsel %vm1062_vm2, %v4043_v18, 0.0 }
 0x980   : > { %1810 = vadd.xlane.f32.xlu0 %v1809_v20 }
 0x996   : > { %1887 = vrot.lane.b32.xlu0 %v4600_v15, %s4242_s27 }
 0x99a   : > { %1973 = vrot.lane.b32.xlu0 %v4602_v16, %s4242_s27 }
 0x99e   : > { %2051 = vrot.lane.b32.xlu0 %v4604_v19, %s4243_s15 }
 0x9a2   : > { %2049 = vrot.lane.b32.xlu0 %v4600_v15, %s4243_s15 }
 0xa0d   : > { %v1811_v21 = vpop.xlane.xlu0 %1810 }
 0xa0e   : > { %4044 = vrcp.f32 %v1811_v21 }
 0xa11   : > { %v1888_v24 = vpop.permute.xlu0 %1887 }
 0xa15   : > { %v1974_v26 = vpop.permute.xlu0 %1973 }
 0xa18   : > { %v4045_v22 = vpop.eup %4044 }
 0xa19   : > { %v1813_v23 = vmul.f32 %v4045_v22, %v4043_v18  ;;  %v2052_v38 = vpop.permute.xlu0 %2051 }
 0xa1b   : > { %3764 = vmatmul.mubr.msk.f32.vlgmr.msra.gmra.mrb[22].mxu1 %vm1062_vm2, %v1813_v23 }
 0xa1c   : > { %3767 = vmatpush3.xpose.msk.msra.mxu1 %vm983_vm1, %v1890_v25  ;;  %3768 = vmatprep.mubr.msk.f32.mxu1 %vm4241_vm0, %v4239_v11  ;;  %v2431_v25 = vsub.s32 7, %v4571_v50 }
 0xa1d   : > { %3771 = vmatprep.subr.mxu1 %v4239_v11 }
 0xa1f   : > { %3769 = vmatmul.mubr.msk.f32.vlgmr.msra.gmra.mrb[24].mxu1 %vm983_vm1, %v1888_v24 }
 0xa20   : > { %3772 = vmatpush3.msra.mxu1 %v1974_v26  ;;  %3773 = vmatprep.mubr.msk.f32.mxu1 %vm4241_vm0, %v4239_v11  ;;  %v4078_v26 = vld [vmem:[#allocation2] sm:$0xff] }
 0xa21   : > { %3776 = vmatprep.subr.mxu1 %v4239_v11 }
 0xaee   : > { %v4702_v27 = vpop.f32.mrb[22].mxu1 }
 0xaef   : > { %v3765_v28 = vpop.f32.mrb[23].mxu1 }
 0xaf2   : > { %v1961_v29 = vpop.f32.mrb[24].mxu1 }
 0xaf3   : > { %v1965_v30 = vmul.f32 1.442695, %v1961_v29  ;;  %v3770_v31 = vpop.f32.mrb[25].mxu1  ;;  %v2432_v29 = vrot.slane %v4577_v52, %v2431_v25  ;;  %v3991_v25 = vld [vmem:[%s4511_s18 + $0xc0] sm:$0xff]  }
 0xaf5   : > { %4046 = vpow2.f32 %v1965_v30 }
 0xaff   : > { %v4047_v32 = vpop.eup %4046 }
 0xb00   : > { %v1967_v34 = vsel %vm1062_vm2, %v4047_v32, 0.0 }
 0xb01   : > { %1968 = vadd.xlane.f32.xlu1 %v1967_v34 }
 0xb12   : > { %2134 = vrot.lane.b32.xlu1 %v4602_v16, %s4243_s15 }
 0xb16   : > { %2212 = vrot.lane.b32.xlu1 %v4604_v19, %s4244_s16  ;;  %v2050_v19 = vpop.permute.xlu0 %2049 }
 0xb1a   : > { %2210 = vrot.lane.b32.xlu1 %v4600_v15, %s4244_s16  ;;  %v3934_v15 = vld [vmem:[%s4499_s29] sm:$0xff]  }
 0xb1b   : > { %3737 = vmatpush3.bf16.msra.mxu0 %v3934_v15 }
 0xb1c   : > { %3738 = vmatprep.subr.bf16.mxu0 %v4239_v11 }
 0xb1f   : > { %3739 = vmatpush3.bf16.msra.mxu0 %v3935_v41 }
 0xb20   : > { %3740 = vmatprep.subr.bf16.mxu0 %v4239_v11 }
 0xb23   : > { %3741 = vmatpush3.bf16.msra.mxu0 %v3936_v42 }
 0xb24   : > { %3742 = vmatprep.subr.bf16.mxu0 %v4239_v11 }
 0xb27   : > { %3743 = vmatpush3.bf16.msra.mxu0 %v3937_v54 }
 0xb28   : > { %3744 = vmatprep.subr.bf16.mxu0 %v4239_v11 }
 0xb2b   : > { %3745 = vmatpush3.bf16.msra.mxu0 %v3938_v55 }
 0xb2c   : > { %3746 = vmatprep.subr.bf16.mxu0 %v4239_v11 }
 0xb2f   : > { %3747 = vmatpush3.bf16.msra.mxu0 %v3939_v57 }
 0xb30   : > { %3748 = vmatprep.subr.bf16.mxu0 %v4239_v11 }
 0xb33   : > { %3749 = vmatpush3.bf16.msra.mxu0 %v3940_v58 }
 0xb34   : > { %3750 = vmatprep.subr.bf16.mxu0 %v4239_v11 }
 0xb37   : > { %3751 = vmatpush3.bf16.msra.mxu0 %v3941_v59 }
 0xb38   : > { %3796 = vmatprep.subr.bf16.mxu0 %v4239_v11 }
 0xb8e   : > { %v1969_v35 = vpop.xlane.xlu1 %1968 }
 0xb8f   : > { %4048 = vrcp.f32 %v1969_v35 }
 0xb92   : > { %v2135_v40 = vpop.permute.xlu1 %2134 }
 0xb96   : > { %v2213_v63 = vpop.permute.xlu1 %2212 }
 0xb99   : > { %v4049_v36 = vpop.eup %4048 }
 0xb9a   : > { %v1971_v39 = vmul.f32 %v4049_v36, %v4047_v32  ;;  %v2211_v4 = vpop.permute.xlu1 %2210 }
 0xb9c   : > { %3774 = vmatmul.mubr.msk.f32.vlgmr.msra.gmra.mrb[26].mxu1 %vm1062_vm2, %v1971_v39 }
 0xb9d   : > { %3777 = vmatpush3.xpose.msk.msra.mxu1 %vm983_vm1, %v2052_v38  ;;  %3778 = vmatprep.mubr.msk.f32.mxu1 %vm4241_vm0, %v4239_v11 }
 0xb9e   : > { %3781 = vmatprep.subr.mxu1 %v4239_v11 }
 0xba0   : > { %3779 = vmatmul.mubr.msk.f32.vlgmr.msra.gmra.mrb[28].mxu1 %vm983_vm1, %v2050_v19 }
 0xba1   : > { %3782 = vmatpush3.msra.mxu1 %v2135_v40  ;;  %3783 = vmatprep.mubr.msk.f32.mxu1 %vm4241_vm0, %v4239_v11 }
 0xba2   : > { %3786 = vmatprep.subr.mxu1 %v4239_v11 }
 0xc6f   : > { %v4726_v43 = vpop.f32.mrb[26].mxu1 }
 0xc70   : > { %v3775_v44 = vpop.f32.mrb[27].mxu1 }
 0xc73   : > { %v2123_v45 = vpop.f32.mrb[28].mxu1 }
 0xc74   : > { %v2127_v46 = vmul.f32 1.442695, %v2123_v45  ;;  %v3780_v48 = vpop.f32.mrb[29].mxu1 }
 0xc75   : > { %v3942_v48 = vld [vmem:[%s4488_s28] ss:$16 sps:$4 sm:$0xff]  }
 0xc76   : > { %4050 = vpow2.f32 %v2127_v46 }
 0xc80   : > { %v4051_v49 = vpop.eup %4050 }
 0xc81   : > { %v2129_v53 = vsel %vm1062_vm2, %v4051_v49, 0.0 }
 0xc82   : > { %2130 = vadd.xlane.f32.xlu0 %v2129_v53  ;;  %v3945_v53 = vld [vmem:[%s4488_s28 + $0x8] ss:$16 sps:$4 sm:$0xff]  }
 0xc98   : > { %2295 = vrot.lane.b32.xlu0 %v4602_v16, %s4244_s16 }
 0xc9c   : > { %1626 = vrot.lane.b32.xlu0 %v4649_v47, %s4244_s16 }
 0xca0   : > { %1630 = vrot.lane.b32.xlu0 %v4665_v0, %s4243_s15 }
 0xca4   : > { %1634 = vrot.lane.b32.xlu0 %v4682_v10, %s4242_s27 }
 0xd0f   : > { %v2131_v16 = vpop.xlane.xlu0 %2130 }
 0xd10   : > { %4052 = vrcp.f32 %v2131_v16  ;;  %v3956_v16 = vld [vmem:[%s4488_s28 + $0x44] ss:$16 sps:$4 sm:$0xff]  }
 0xd13   : > { %v2296_v60 = vpop.permute.xlu0 %2295 }
 0xd17   : > { %v1627_v61 = vpop.permute.xlu0 %1626 }
 0xd18   : > { %v1637_v0 = vsel %vm983_vm1, %v4634_v33, %v1627_v61  ;;  %v3954_v61 = vld [vmem:[%s4488_s28 + $0x40] ss:$16 sps:$4 sm:$0xff]  }
 0xd1a   : > { %v4053_v62 = vpop.eup %4052 }
 0xd1b   : > { %v2133_v47 = vmul.f32 %v4053_v62, %v4051_v49  ;;  %v1631_v1 = vpop.permute.xlu0 %1630  ;;  %v3944_v49 = vld [vmem:[%s4488_s28 + $0x4] ss:$16 sps:$4 sm:$0xff]   ;;  %v3957_v62 = vld [vmem:[%s4488_s28 + $0x48] ss:$16 sps:$4 sm:$0xff]  }
 0xd1c   : > { %v1639_v2 = vsel %vm1638_vm3, %v1637_v0, %v1631_v1 }
 0xd1d   : > { %3784 = vmatmul.mubr.msk.f32.vlgmr.msra.gmra.mrb[30].mxu1 %vm1062_vm2, %v2133_v47 }
 0xd1e   : > { %3787 = vmatpush3.xpose.msk.msra.mxu1 %vm983_vm1, %v2213_v63  ;;  %3788 = vmatprep.mubr.msk.f32.mxu1 %vm4241_vm0, %v4239_v11 }
 0xd1f   : > { %v1635_v3 = vpop.permute.xlu0 %1634  ;;  %3791 = vmatprep.subr.mxu1 %v4239_v11 }
 0xd20   : > { %v1641_v5 = vsel %vm1640_vm4, %v1639_v2, %v1635_v3  ;;  %v3962_v2 = vld [vmem:[%s4488_s28 + $0x64] ss:$16 sps:$4 sm:$0xff]   ;;  %v3965_v3 = vld [vmem:[%s4488_s28 + $0x6c] ss:$16 sps:$4 sm:$0xff]  }
 0xd21   : > { %v1642_v6 = vpack.c.bf16 %v1641_v5, %v1641_v5  ;;  %3789 = vmatmul.mubr.msk.f32.vlgmr.msra.gmra.mrb[32].mxu1 %vm983_vm1, %v2211_v4  ;;  %v3960_v4 = vld [vmem:[%s4488_s28 + $0x60] ss:$16 sps:$4 sm:$0xff]   ;;  %v3963_v5 = vld [vmem:[%s4488_s28 + $0x68] ss:$16 sps:$4 sm:$0xff]  }
 0xd22   : > { %3792 = vmatpush3.msra.mxu1 %v2296_v60  ;;  %3793 = vmatprep.mubr.msk.f32.mxu1 %vm4241_vm0, %v4239_v11  ;;  %v3959_v60 = vld [vmem:[%s4488_s28 + $0x4c] ss:$16 sps:$4 sm:$0xff]  }
 0xd23   : > { %3753 = vmatmul.mubr.bf16.vlgmr.msra.gmra.mrb[4].mxu0 %v1642_v6  ;;  %2651 = vmatprep.subr.bf16.mxu1 %v3944_v49  ;;  %v3968_v6 = vld [vmem:[%s4488_s28 + $0x84] ss:$16 sps:$4 sm:$0xff]   ;;  %v3994_v49 = vld [vmem:[%s4511_s18 + $0x48] sm:$0xff]  }
 0xd24   : > { %3797 = vmatpush3.bf16.msra.mxu0 %v3934_v15  ;;  %3812 = vmatprep.mubr.msk.bf16.mxu0 %vm4241_vm0, %v4239_v11 }
 0xd25   : > { %3798 = vmatprep.subr.bf16.mxu0 %v4239_v11 }
 0xd28   : > { %3799 = vmatpush3.bf16.msra.mxu0 %v3935_v41 }
 0xd29   : > { %3800 = vmatprep.subr.bf16.mxu0 %v4239_v11 }
 0xd2c   : > { %3801 = vmatpush3.bf16.msra.mxu0 %v3936_v42  ;;  %v4079_v42 = vld [vmem:[#allocation2 + $0x8] sm:$0xff] }
 0xd2d   : > { %3802 = vmatprep.subr.bf16.mxu0 %v4239_v11 }
 0xd30   : > { %3803 = vmatpush3.bf16.msra.mxu0 %v3937_v54  ;;  %v3947_v54 = vld [vmem:[%s4488_s28 + $0xc] ss:$16 sps:$4 sm:$0xff]  }
 0xd31   : > { %3804 = vmatprep.subr.bf16.mxu0 %v4239_v11 }
 0xd34   : > { %3805 = vmatpush3.bf16.msra.mxu0 %v3938_v55  ;;  %v3950_v55 = vld [vmem:[%s4488_s28 + $0x24] ss:$16 sps:$4 sm:$0xff]  }
 0xd35   : > { %3806 = vmatprep.subr.bf16.mxu0 %v4239_v11 }
 0xd38   : > { %3807 = vmatpush3.bf16.msra.mxu0 %v3939_v57  ;;  %v3953_v57 = vld [vmem:[%s4488_s28 + $0x2c] ss:$16 sps:$4 sm:$0xff]  }
 0xd39   : > { %3808 = vmatprep.subr.bf16.mxu0 %v4239_v11 }
 0xd3c   : > { %3809 = vmatpush3.bf16.msra.mxu0 %v3940_v58  ;;  %v3948_v58 = vld [vmem:[%s4488_s28 + $0x20] ss:$16 sps:$4 sm:$0xff]  }
 0xd3d   : > { %3810 = vmatprep.subr.bf16.mxu0 %v4239_v11 }
 0xd40   : > { %3811 = vmatpush3.bf16.msra.mxu0 %v3941_v59  ;;  %v3951_v59 = vld [vmem:[%s4488_s28 + $0x28] ss:$16 sps:$4 sm:$0xff]  }
 0xd41   : > { %2694 = vmatprep.subr.bf16.mxu0 %v3947_v54  ;;  %v3998_v54 = vld [vmem:[%s4511_s18 + $0x50] sm:$0xff]  }
 0xdf0   : > { %v2206_v33 = vpop.f32.mrb[30].mxu1 }
 0xdf1   : > { %2376 = vrot.lane.b32.xlu0 %v2206_v33, %s4243_s15  ;;  %v3785_v7 = vpop.f32.mrb[31].mxu1  ;;  %v3971_v33 = vld [vmem:[%s4488_s28 + $0x8c] ss:$16 sps:$4 sm:$0xff]  }
 0xdf2   : > { %v3966_v7 = vld [vmem:[%s4488_s28 + $0x80] ss:$16 sps:$4 sm:$0xff]  }
 0xdf4   : > { %v2284_v8 = vpop.f32.mrb[32].mxu1 }
 0xdf5   : > { %v2288_v9 = vmul.f32 1.442695, %v2284_v8  ;;  %v3790_v10 = vpop.f32.mrb[33].mxu1  ;;  %v3969_v8 = vld [vmem:[%s4488_s28 + $0x88] ss:$16 sps:$4 sm:$0xff]  }
 0xdf6   : > { %v1725_v12 = vpop.f32.mrb[4].mxu0  ;;  %v3977_v10 = vld [vmem:[%s4488_s28 + $0xac] ss:$16 sps:$4 sm:$0xff]  }
 0xdf7   : > { %4054 = vpow2.f32 %v2288_v9  ;;  %v3754_v13 = vpop.f32.mrb[5].mxu0  ;;  %v2427_v28 = vadd.f32 %v4078_v26, %v1725_v12  ;;  %v3974_v9 = vld [vmem:[%s4488_s28 + $0xa4] ss:$16 sps:$4 sm:$0xff]   ;;  %v3972_v12 = vld [vmem:[%s4488_s28 + $0xa0] ss:$16 sps:$4 sm:$0xff]  }
 0xdf8   : > { %v1728_v14 = vpop.f32.mrb[6].mxu0  ;;  %v3975_v13 = vld [vmem:[%s4488_s28 + $0xa8] ss:$16 sps:$4 sm:$0xff]  }
 0xdf9   : > { %v3755_v17 = vpop.f32.mrb[7].mxu0  ;;  %v4777_v30 = vadd.f32 %v2432_v29, %v2427_v28  ;;  %v3980_v14 = vld [vmem:[%s4488_s28 + $0xc4] ss:$16 sps:$4 sm:$0xff]  }
 0xdfa   : > { %v3983_v17 = vld [vmem:[%s4488_s28 + $0xcc] ss:$16 sps:$4 sm:$0xff]  }
 0xe01   : > { %v4055_v18 = vpop.eup %4054 }
 0xe02   : > { %v2290_v20 = vsel %vm1062_vm2, %v4055_v18, 0.0 }
 0xe03   : > { %2291 = vadd.xlane.f32.xlu1 %v2290_v20  ;;  %v3981_v20 = vld [vmem:[%s4488_s28 + $0xc8] ss:$16 sps:$4 sm:$0xff]  }
 0xe14   : > { %2372 = vrot.lane.b32.xlu1 %v4726_v43, %s4244_s16 }
 0xe63   : > { %v2377_v32 = vpop.permute.xlu0 %2376 }
 0xe90   : > { %v2292_v11 = vpop.xlane.xlu1 %2291 }
 0xe91   : > { %4056 = vrcp.f32 %v2292_v11  ;;  %v3986_v11 = vld [vmem:[%s4488_s28 + $0xe4] ss:$16 sps:$4 sm:$0xff]  }
 0xe94   : > { %v2373_v31 = vpop.permute.xlu1 %2372 }
 0xe95   : > { %v2383_v34 = vsel %vm983_vm1, %v4702_v27, %v2373_v31 }
 0xe96   : > { %v2384_v35 = vsel %vm1638_vm3, %v2383_v34, %v2377_v32 }
 0xe9b   : > { %v4057_v21 = vpop.eup %4056 }
 0xe9c   : > { %v2294_v22 = vmul.f32 %v4057_v21, %v4055_v18  ;;  %v3978_v18 = vld [vmem:[%s4488_s28 + $0xc0] ss:$16 sps:$4 sm:$0xff]   ;;  %v3989_v21 = vld [vmem:[%s4488_s28 + $0xec] ss:$16 sps:$4 sm:$0xff]  }
 0xe9e   : > { %3794 = vmatmul.mubr.msk.f32.vlgmr.msra.gmra.mrb[34].mxu1 %vm1062_vm2, %v2294_v22  ;;  %v3984_v22 = vld [vmem:[%s4488_s28 + $0xe0] ss:$16 sps:$4 sm:$0xff]  }
 0xe9f   : > { %2683 = vmatprep.mubr.bf16.mxu1 %v4240_v37  ;;  %2652 = vmatpush1.bf16.msra.mxu1 %v3942_v48 }
 0xea0   : > { %2653 = vmatprep.subr.bf16.mxu1 %v3950_v55  ;;  %v3999_v55 = vld [vmem:[%s4511_s18 + $0xd0] sm:$0xff]  }
 0xea3   : > { %2654 = vmatpush1.bf16.msra.mxu1 %v3948_v58  ;;  %v4001_v58 = vld [vmem:[%s4511_s18 + $0x90] sm:$0xff]  }
 0xea4   : > { %2655 = vmatprep.subr.bf16.mxu1 %v3956_v16  ;;  %v4003_v16 = vld [vmem:[%s4511_s18 + $0xd8] sm:$0xff]  }
 0xea7   : > { %2656 = vmatpush1.bf16.msra.mxu1 %v3954_v61  ;;  %v4005_v61 = vld [vmem:[%s4511_s18 + $0x98] sm:$0xff]  }
 0xea8   : > { %2657 = vmatprep.subr.bf16.mxu1 %v3962_v2  ;;  %v4011_v2 = vld [vmem:[%s4511_s18 + $0xe8] sm:$0xff]  }
 0xeab   : > { %2658 = vmatpush1.bf16.msra.mxu1 %v3960_v4  ;;  %v4013_v4 = vld [vmem:[%s4511_s18 + $0xa8] sm:$0xff]  }
 0xeac   : > { %2659 = vmatprep.subr.bf16.mxu1 %v3968_v6  ;;  %v4015_v6 = vld [vmem:[%s4511_s18 + $0xf0] sm:$0xff]  }
 0xeaf   : > { %2660 = vmatpush1.bf16.msra.mxu1 %v3966_v7  ;;  %v4017_v7 = vld [vmem:[%s4511_s18 + $0xb0] sm:$0xff]  }
 0xeb0   : > { %2661 = vmatprep.subr.bf16.mxu1 %v3974_v9  ;;  %v4019_v9 = vld [vmem:[%s4511_s18 + $0xf8] sm:$0xff]  }
 0xeb3   : > { %2662 = vmatpush1.bf16.msra.mxu1 %v3972_v12  ;;  %v4021_v12 = vld [vmem:[%s4511_s18 + $0xb8] sm:$0xff]  }
 0xeb4   : > { %2663 = vmatprep.subr.bf16.mxu1 %v3980_v14 }
 0xeb7   : > { %2664 = vmatpush1.bf16.msra.mxu1 %v3978_v18 }
 0xeb8   : > { %2665 = vmatprep.subr.bf16.mxu1 %v3986_v11 }
 0xebb   : > { %2666 = vmatpush1.bf16.msra.mxu1 %v3984_v22 }
 0xf71   : > { %v2367_v23 = vpop.f32.mrb[34].mxu1 }
 0xf72   : > { %2380 = vrot.lane.b32.xlu0 %v2367_v23, %s4242_s27  ;;  %v3795_v24 = vpop.f32.mrb[35].mxu1  ;;  %v3987_v23 = vld [vmem:[%s4488_s28 + $0xe8] ss:$16 sps:$4 sm:$0xff]  }
 0xf73   : > { %v3990_v24 = vld [vmem:[%s4511_s18 + $0x40] sm:$0xff]  }
 0xf74   : > { %3623 = vmatprep.subr.bf16.mxu1 %v3990_v24 }
 0xf91   : > { %2435 = vadd.xlane.f32.xlu0 %v4777_v30 }
 0xfe4   : > { %v2381_v36 = vpop.permute.xlu0 %2380 }
 0xfe5   : > { %v2385_v38 = vsel %vm1640_vm4, %v2384_v35, %v2381_v36  ;;  %v4829_v35 = vsub.s32 2, %v4571_v50 }
 0xfe6   : > { %v2386_v39 = vpack.c.bf16 %v2385_v38, %v2385_v38 }
 0xfe8   : > { %3813 = vmatmul.mubr.bf16.vlgmr.msra.gmra.mrb[8].mxu0 %v2386_v39  ;;  %v2460_v39 = vrot.slane %v4577_v52, %v4829_v35 }
 0xfe9   : > { %2726 = vmatprep.mubr.bf16.mxu0 %v4240_v37  ;;  %2695 = vmatpush1.bf16.msra.mxu0 %v3945_v53  ;;  %v3996_v53 = vld [vmem:[%s4511_s18 + $0x8] sm:$0xff]  }
 0xfea   : > { %2696 = vmatprep.subr.bf16.mxu0 %v3953_v57  ;;  %v4000_v57 = vld [vmem:[%s4511_s18 + $0x10] sm:$0xff]  }
 0xfed   : > { %2697 = vmatpush1.bf16.msra.mxu0 %v3951_v59  ;;  %v4002_v59 = vld [vmem:[%s4511_s18 + $0x58] sm:$0xff]  }
 0xfee   : > { %2698 = vmatprep.subr.bf16.mxu0 %v3959_v60  ;;  %v4004_v60 = vld [vmem:[%s4511_s18 + $0x18] sm:$0xff]  }
 0xff1   : > { %2699 = vmatpush1.bf16.msra.mxu0 %v3957_v62  ;;  %v4006_v62 = vld [vmem:[%s4511_s18 + $0x60] sm:$0xff]  }
 0xff2   : > { %2700 = vmatprep.subr.bf16.mxu0 %v3965_v3  ;;  %v4012_v3 = vld [vmem:[%s4511_s18 + $0x28] sm:$0xff]  }
 0xff5   : > { %2701 = vmatpush1.bf16.msra.mxu0 %v3963_v5  ;;  %v4014_v5 = vld [vmem:[%s4511_s18 + $0x70] sm:$0xff]  }
 0xff6   : > { %2702 = vmatprep.subr.bf16.mxu0 %v3971_v33  ;;  %v4016_v33 = vld [vmem:[%s4511_s18 + $0x30] sm:$0xff]  }
 0xff9   : > { %2703 = vmatpush1.bf16.msra.mxu0 %v3969_v8  ;;  %v4018_v8 = vld [vmem:[%s4511_s18 + $0x78] sm:$0xff]  }
 0xffa   : > { %2704 = vmatprep.subr.bf16.mxu0 %v3977_v10  ;;  %v4020_v10 = vld [vmem:[%s4511_s18 + $0x38] sm:$0xff]  }
 0xffd   : > { %2705 = vmatpush1.bf16.msra.mxu0 %v3975_v13  ;;  %v714_v13 = vld [vmem:[%s4509_s20] sm:$0xf] }
 0xffe   : > { %2706 = vmatprep.subr.bf16.mxu0 %v3983_v17  ;;  %v2474_v14 = vrot.slane %v714_v13, %v4574_v51  ;;  %v2482_v17 = vrot.slane %v714_v13, %v4829_v35  ;;  %v2478_v18 = vrot.slane %v714_v13, %v4583_v56 }
0x1001   : > { %2707 = vmatpush1.bf16.msra.mxu0 %v3981_v20 }
0x1002   : > { %2708 = vmatprep.subr.bf16.mxu0 %v3989_v21 }
0x1005   : > { %2709 = vmatpush1.bf16.msra.mxu0 %v3987_v23 }
0x1006   : > { %3645 = vmatprep.subr.bf16.mxu0 %v3991_v25 }
0x101e   : > { %v2436_v19 = vpop.xlane.xlu0 %2435 }
0x101f   : > { %v2439_v40 = vmul.f32 0.0078125, %v2436_v19  ;;  %v4835_v19 = vsub.s32 3, %v4571_v50  ;;  %v3995_v50 = vld [vmem:[%s4511_s18 + $0xc8] sm:$0xff]  }
0x1021   : > { %v4786_v15 = vsub.f32 %v4777_v30, %v2439_v40  ;;  %v2486_v20 = vrot.slane %v714_v13, %v4835_v19 }
0x1023   : > { %v2443_v27 = vmul.f32 %v4786_v15, %v4786_v15 }
0x1025   : > { %2445 = vadd.xlane.f32.xlu0 %v2443_v27 }
0x10b2   : > { %v2446_v26 = vpop.xlane.xlu0 %2445 }
0x10b3   : > { %v2449_v28 = vmul.f32 0.0078125, %v2446_v26 }
0x10bb   : > { %v2421_v41 = vpop.f32.mrb[8].mxu0 }
0x10bc   : > { %v2428_v43 = vadd.f32 %v4079_v42, %v2421_v41  ;;  %v3814_v44 = vpop.f32.mrb[9].mxu0  ;;  %v2466_v42 = vrot.slane %v4577_v52, %v4835_v19  ;;  %v3997_v52 = vld [vmem:[%s4511_s18 + $0x88] sm:$0xff]  }
0x10bd   : > { %v2424_v45 = vpop.f32.mrb[10].mxu0 }
0x10be   : > { %v4790_v37 = vadd.f32 %v2432_v29, %v2428_v43  ;;  %v3815_v46 = vpop.f32.mrb[11].mxu0  ;;  %v2451_v29 = vadd.f32 1e-05, %v2449_v28 }
0x10bf   : > { %v3992_v46 = vld [vmem:[%s4511_s18] sm:$0xff]  }
0x10c0   : > { %2437 = vadd.xlane.f32.xlu1 %v4790_v37  ;;  %4058 = vrsqrt.f32 %v2451_v29 }
0x10ca   : > { %v4059_v36 = vpop.eup %4058 }
0x10cb   : > { %v2455_v38 = vmul.f32 %v4059_v36, %v4786_v15  ;;  %v3993_v15 = vld [vmem:[%s4511_s18 + $0x80] sm:$0xff]  }
0x10cd   : > { %v2461_v41 = vmul.f32 %v2460_v39, %v2455_v38 }
0x10cf   : > { %v2467_v44 = vadd.f32 %v2466_v42, %v2461_v41 }
0x114d   : > { %v2438_v63 = vpop.xlane.xlu1 %2437 }
0x114e   : > { %v2440_v47 = vmul.f32 0.0078125, %v2438_v63  ;;  %v4007_v63 = vld [vmem:[%s4511_s18 + $0xe0] sm:$0xff]  }
0x1150   : > { %v2442_v1 = vsub.f32 %v4790_v37, %v2440_v47  ;;  %v4008_v47 = vld [vmem:[%s4511_s18 + $0x20] sm:$0xff]  }
0x1152   : > { %v2444_v0 = vmul.f32 %v2442_v1, %v2442_v1 }
0x1154   : > { %2447 = vadd.xlane.f32.xlu0 %v2444_v0  ;;  %v4010_v0 = vld [vmem:[%s4511_s18 + $0x68] sm:$0xff]  }
0x11e1   : > { %v2448_v31 = vpop.xlane.xlu0 %2447 }
0x11e2   : > { %v2450_v32 = vmul.f32 0.0078125, %v2448_v31 }
0x11e4   : > { %v2452_v34 = vadd.f32 1e-05, %v2450_v32 }
0x11e6   : > { %4060 = vrsqrt.f32 %v2452_v34 }
0x11f0   : > { %v4061_v40 = vpop.eup %4060 }
0x11f1   : > { %v2456_v27 = vmul.f32 %v4061_v40, %v2442_v1  ;;  %v4009_v1 = vld [vmem:[%s4511_s18 + $0xa0] sm:$0xff]  }
0x11f3   : > { %v2462_v43 = vmul.f32 %v2460_v39, %v2456_v27 }
0x11f5   : > { %v2468_v45 = vadd.f32 %v2466_v42, %v2462_v43 }
0x11f7   : > { %v2469_v48 = vpack.c.bf16 %v2468_v45, %v2467_v44 }
0x11f9   : > { %2684 = vmatmul.mubr.bf16.vlgmr.msra.gmra.mrb[36].mxu1 %v2469_v48  ;;  %2727 = vmatmul.mubr.bf16.vlgmr.msra.gmra.mrb[12].mxu0 %v2469_v48 }
0x11fa   : > { %3624 = vmatpush3.bf16.msra.mxu1 %v3992_v46  ;;  %3646 = vmatpush3.bf16.msra.mxu0 %v3993_v15 }
0x11fb   : > { %3625 = vmatprep.subr.bf16.mxu1 %v3994_v49  ;;  %3647 = vmatprep.subr.bf16.mxu0 %v3995_v50 }
0x11fe   : > { %3626 = vmatpush3.bf16.msra.mxu1 %v3996_v53  ;;  %3648 = vmatpush3.bf16.msra.mxu0 %v3997_v52 }
0x11ff   : > { %3627 = vmatprep.subr.bf16.mxu1 %v3998_v54  ;;  %3649 = vmatprep.subr.bf16.mxu0 %v3999_v55 }
0x1202   : > { %3628 = vmatpush3.bf16.msra.mxu1 %v4000_v57  ;;  %3650 = vmatpush3.bf16.msra.mxu0 %v4001_v58 }
0x1203   : > { %3629 = vmatprep.subr.bf16.mxu1 %v4002_v59  ;;  %3651 = vmatprep.subr.bf16.mxu0 %v4003_v16 }
0x1206   : > { %3630 = vmatpush3.bf16.msra.mxu1 %v4004_v60  ;;  %3652 = vmatpush3.bf16.msra.mxu0 %v4005_v61 }
0x1207   : > { %3631 = vmatprep.subr.bf16.mxu1 %v4006_v62  ;;  %3653 = vmatprep.subr.bf16.mxu0 %v4007_v63 }
0x120a   : > { %3632 = vmatpush3.bf16.msra.mxu1 %v4008_v47  ;;  %3654 = vmatpush3.bf16.msra.mxu0 %v4009_v1 }
0x120b   : > { %3633 = vmatprep.subr.bf16.mxu1 %v4010_v0  ;;  %3655 = vmatprep.subr.bf16.mxu0 %v4011_v2 }
0x120e   : > { %3634 = vmatpush3.bf16.msra.mxu1 %v4012_v3  ;;  %3656 = vmatpush3.bf16.msra.mxu0 %v4013_v4 }
0x120f   : > { %3635 = vmatprep.subr.bf16.mxu1 %v4014_v5  ;;  %3657 = vmatprep.subr.bf16.mxu0 %v4015_v6 }
0x1212   : > { %3636 = vmatpush3.bf16.msra.mxu1 %v4016_v33  ;;  %3658 = vmatpush3.bf16.msra.mxu0 %v4017_v7 }
0x1213   : > { %3637 = vmatprep.subr.bf16.mxu1 %v4018_v8  ;;  %3659 = vmatprep.subr.bf16.mxu0 %v4019_v9 }
0x1216   : > { %3638 = vmatpush3.bf16.msra.mxu1 %v4020_v10  ;;  %3660 = vmatpush3.bf16.msra.mxu0 %v4021_v12 }
0x12cc   : > { %v2685_v11 = vpop.f32.mrb[36].mxu1  ;;  %v2728_v21 = vpop.f32.mrb[12].mxu0 }
0x12cd   : > { %v2686_v22 = vadd.f32 %v2685_v11, %v2474_v14  ;;  %v2729_v23 = vadd.f32 %v2728_v21, %v2482_v17  ;;  %v2687_v24 = vpop.f32.mrb[37].mxu1  ;;  %v2730_v25 = vpop.f32.mrb[13].mxu0 }
0x12ce   : > { %v2688_v26 = vadd.f32 %v2687_v24, %v2478_v18  ;;  %v2731_v28 = vadd.f32 %v2730_v25, %v2486_v20  ;;  %v2689_v29 = vpop.f32.mrb[38].mxu1  ;;  %v2732_v31 = vpop.f32.mrb[14].mxu0 }
0x12cf   : > { %v2745_v32 = vmul.f32 0.70710677, %v2686_v22  ;;  %v2747_v34 = vmul.f32 0.70710677, %v2729_v23  ;;  %v2690_v39 = vadd.f32 %v2689_v29, %v2474_v14  ;;  %v2733_v40 = vadd.f32 %v2732_v31, %v2482_v17  ;;  %v2691_v27 = vpop.f32.mrb[39].mxu1  ;;  %v2734_v41 = vpop.f32.mrb[15].mxu0 }
0x12d0   : > { %v2746_v36 = vmul.f32 0.70710677, %v2688_v26  ;;  %v2748_v38 = vmul.f32 0.70710677, %v2731_v28  ;;  %v2692_v42 = vadd.f32 %v2691_v27, %v2478_v18  ;;  %v2735_v43 = vadd.f32 %v2734_v41, %v2486_v20 }
0x12d1   : > { %4062 = verf.f32 %v2745_v32  ;;  %v2749_v44 = vmul.f32 0.70710677, %v2690_v39  ;;  %v2751_v45 = vmul.f32 0.70710677, %v2733_v40  ;;  %v2737_v55 = vmul.f32 0.5, %v2686_v22 }
0x12d2   : > { %4064 = verf.f32 %v2747_v34  ;;  %v2750_v46 = vmul.f32 0.70710677, %v2692_v42  ;;  %v2752_v15 = vmul.f32 0.70710677, %v2735_v43  ;;  %v2739_v57 = vmul.f32 0.5, %v2729_v23 }
0x12d3   : > { %4066 = verf.f32 %v2746_v36  ;;  %v2738_v16 = vmul.f32 0.5, %v2688_v26  ;;  %v2741_v61 = vmul.f32 0.5, %v2690_v39  ;;  %v2740_v47 = vmul.f32 0.5, %v2731_v28 }
0x12d4   : > { %4068 = verf.f32 %v2748_v38  ;;  %v2743_v0 = vmul.f32 0.5, %v2733_v40  ;;  %v2742_v6 = vmul.f32 0.5, %v2692_v42  ;;  %v2744_v9 = vmul.f32 0.5, %v2735_v43  ;;  %v3547_v40 = vld [vmem:[%s4504_s19 + $0x8] ss:$0 sm:$0xff] }
0x12d5   : > { %4070 = verf.f32 %v2749_v44 }
0x12d6   : > { %4072 = verf.f32 %v2751_v45 }
0x12d7   : > { %4074 = verf.f32 %v2750_v46 }
0x12d8   : > { %4076 = verf.f32 %v2752_v15  ;;  %v4080_v15 = vld [vmem:[%s4948_s9] sm:$0xff] (!%p3548_p7)  }
0x12db   : > { %v4063_v48 = vpop.eup %4062 }
0x12dc   : > { %v4065_v49 = vpop.eup %4064  ;;  %v2761_v52 = vadd.f32 1.0, %v4063_v48  ;;  %v4245_v48 = vmov (!%p3548_p7), 0.0  }
0x12dd   : > { %v4067_v50 = vpop.eup %4066  ;;  %v2763_v58 = vadd.f32 1.0, %v4065_v49  ;;  %3816 = vmatprep.subr.bf16.mxu0 (!%p3548_p7), %v4245_v48 }
0x12de   : > { %v4069_v53 = vpop.eup %4068  ;;  %v2762_v60 = vadd.f32 1.0, %v4067_v50  ;;  %v2769_v4 = vmul.f32 %v2761_v52, %v2737_v55 }
0x12df   : > { %v4071_v54 = vpop.eup %4070  ;;  %v2764_v1 = vadd.f32 1.0, %v4069_v53  ;;  %v2771_v7 = vmul.f32 %v2763_v58, %v2739_v57  ;;  %v4081_v57 = vld [vmem:[%s4948_s9 + $0x8] sm:$0xff] (!%p3548_p7)   ;;  %v4082_v58 = vld [vmem:[%s4948_s9 + $0x10] sm:$0xff] (!%p3548_p7)  }
0x12e0   : > { %v4073_v59 = vpop.eup %4072  ;;  %v2765_v62 = vadd.f32 1.0, %v4071_v54  ;;  %v2770_v12 = vmul.f32 %v2762_v60, %v2738_v16  ;;  %v4084_v16 = vld [vmem:[%s4948_s9 + $0x20] sm:$0xff] (!%p3548_p7)   ;;  %v4085_v60 = vld [vmem:[%s4948_s9 + $0x28] sm:$0xff] (!%p3548_p7)  }
0x12e1   : > { %v4075_v63 = vpop.eup %4074  ;;  %v2767_v2 = vadd.f32 1.0, %v4073_v59  ;;  %v2772_v17 = vmul.f32 %v2764_v1, %v2740_v47  ;;  %v4083_v59 = vld [vmem:[%s4948_s9 + $0x18] sm:$0xff] (!%p3548_p7)  }
0x12e2   : > { %v4077_v3 = vpop.eup %4076  ;;  %v2773_v5 = vmul.f32 %v2765_v62, %v2741_v61  ;;  %v2766_v33 = vadd.f32 1.0, %v4075_v63  ;;  %v4086_v61 = vld [vmem:[%s4948_s9 + $0x30] sm:$0xff] (!%p3548_p7)   ;;  %v4087_v62 = vld [vmem:[%s4948_s9 + $0x38] sm:$0xff] (!%p3548_p7)  }
0x12e3   : > { %v2775_v8 = vmul.f32 %v2767_v2, %v2743_v0  ;;  %v2768_v10 = vadd.f32 1.0, %v4077_v3 }
0x12e4   : > { %v2777_v13 = vpack.c.bf16 %v2773_v5, %v2769_v4  ;;  %v2774_v14 = vmul.f32 %v2766_v33, %v2742_v6  ;;  %v3069_v4 = vld [vmem:[%s4947_s8] sm:$0x3] (!%p3548_p7) }
0x12e5   : > { %v2779_v18 = vpack.c.bf16 %v2775_v8, %v2771_v7  ;;  %v2776_v20 = vmul.f32 %v2768_v10, %v2744_v9  ;;  %v3097_v33 = vrot.slane (!%p3548_p7), %v3069_v4, %v4574_v51  ;;  %v3103_v10 = vrot.slane (!%p3548_p7), %v3069_v4, %v4583_v56 }
0x12e6   : > { %v2778_v11 = vpack.c.bf16 %v2774_v14, %v2770_v12 }
0x12e7   : > { %v2780_v21 = vpack.c.bf16 %v2776_v20, %v2772_v17 }
0x12e8   : > { %3005 = vmatprep.mubr.bf16.mxu1 %v2778_v11 }
0x12e9   : > { %3046 = vmatprep.mubr.bf16.mxu0 %v2780_v21  ;;  %3006 = vmatmul.mubr.bf16.vlgmr.msra.gmra.mrb[40].mxu1 %v2777_v13 }
0x12ea   : > { %3047 = vmatmul.mubr.bf16.vlgmr.msra.gmra.mrb[16].mxu0 %v2779_v18  ;;  %v3106_v18 = vld [vmem:[%s4949_s10] sm:$0xf] (!%p3548_p7) }
0x12eb   : > { %3817 = vmatpush3.bf16.msra.mxu0 (!%p3548_p7), %v4080_v15  ;;  %3832 = vmatprep.mubr.msk.bf16.mxu0 (!%p3548_p7), %vm4246_vm5, %v4245_v48  ;;  %v3127_v20 = vrot.slane (!%p3548_p7), %v3106_v18, %v4574_v51 }
0x12ec   : > { %3818 = vmatprep.subr.bf16.mxu0 (!%p3548_p7), %v4245_v48 }
0x12ef   : > { %3819 = vmatpush3.bf16.msra.mxu0 (!%p3548_p7), %v4081_v57  ;;  %v3257_v57 = vrot.slane (!%p3548_p7), %v3106_v18, %v4583_v56  ;;  %v3557_v56 = vld [vmem:[#allocation3] ss:$0 sm:$0xff] (!%p3548_p7) }
0x12f0   : > { %3820 = vmatprep.subr.bf16.mxu0 (!%p3548_p7), %v4245_v48 }
0x12f3   : > { %3821 = vmatpush3.bf16.msra.mxu0 (!%p3548_p7), %v4082_v58 }
0x12f4   : > { %3822 = vmatprep.subr.bf16.mxu0 (!%p3548_p7), %v4245_v48 }
0x12f7   : > { %3823 = vmatpush3.bf16.msra.mxu0 (!%p3548_p7), %v4083_v59 }
0x12f8   : > { %3824 = vmatprep.subr.bf16.mxu0 (!%p3548_p7), %v4245_v48 }
0x12fb   : > { %3825 = vmatpush3.bf16.msra.mxu0 (!%p3548_p7), %v4084_v16  ;;  %v3263_v16 = vrot.slane (!%p3548_p7), %v3106_v18, %v4829_v35 }
0x12fc   : > { %3826 = vmatprep.subr.bf16.mxu0 (!%p3548_p7), %v4245_v48 }
0x12ff   : > { %3827 = vmatpush3.bf16.msra.mxu0 (!%p3548_p7), %v4085_v60 }
0x1300   : > { %3828 = vmatprep.subr.bf16.mxu0 (!%p3548_p7), %v4245_v48 }
0x1303   : > { %3829 = vmatpush3.bf16.msra.mxu0 (!%p3548_p7), %v4086_v61 }
0x1304   : > { %3830 = vmatprep.subr.bf16.mxu0 (!%p3548_p7), %v4245_v48 }
0x1307   : > { %3831 = vmatpush3.bf16.msra.mxu0 (!%p3548_p7), %v4087_v62  ;;  %v3269_v62 = vrot.slane (!%p3548_p7), %v3106_v18, %v4835_v19 }
0x13bc   : > { %v3639_v22 = vpop.f32.mrb[40].mxu1 }
0x13bd   : > { %v3661_v23 = vpop.f32.mrb[16].mxu0  ;;  %v3640_v24 = vpop.f32.mrb[41].mxu1 }
0x13be   : > { %v3641_v25 = vadd.f32 %v3640_v24, %v3639_v22  ;;  %v3662_v26 = vpop.f32.mrb[17].mxu0  ;;  %v3642_v28 = vpop.f32.mrb[42].mxu1 }
0x13bf   : > { %v3663_v29 = vadd.f32 %v3662_v26, %v3661_v23  ;;  %v3664_v31 = vpop.f32.mrb[18].mxu0  ;;  %v3643_v32 = vpop.f32.mrb[43].mxu1 }
0x13c0   : > { %v3644_v34 = vadd.f32 %v3643_v32, %v3642_v28  ;;  %v3665_v36 = vpop.f32.mrb[19].mxu0 }
0x13c1   : > { %v3049_v38 = vadd.f32 %v3663_v29, %v3641_v25  ;;  %v3666_v39 = vadd.f32 %v3665_v36, %v3664_v31 }
0x13c3   : > { %v3055_v27 = vadd.f32 %v3049_v38, %v4777_v30  ;;  %v3052_v41 = vadd.f32 %v3666_v39, %v3644_v34  ;;  %3068 = sbr.rel (%p3548_p7) target bundleno = 6082 (0x17c2), region = 88 }
0x13c5   : > { %v3061_v42 = vadd.f32 %v3547_v40, %v3055_v27  ;;  %v3056_v43 = vadd.f32 %v3052_v41, %v4790_v37 }
0x13c7   : > { %3063 = vst [vmem:[#allocation2] sm:$0xff] %v3061_v42  ;;  %v3062_v44 = vadd.f32 %v3547_v40, %v3056_v43 }
0x13c9   : > { %3064 = vst [vmem:[#allocation2 + $0x8] sm:$0xff] %v3062_v44 }
0x13ce   : > { %v3070_v45 = vld [vmem:[#allocation2] sm:$0xff] }
0x13cf   : > { %3072 = vadd.xlane.f32.xlu0 %v3070_v45 }
0x13d0   : > { %v3071_v46 = vld [vmem:[#allocation2 + $0x8] sm:$0xff] }
0x13d3   : > { %3074 = vadd.xlane.f32.xlu0 %v3071_v46 }
0x145c   : > { %v3073_v30 = vpop.xlane.xlu0 %3072 }
0x145d   : > { %v3076_v37 = vmul.f32 0.0078125, %v3073_v30 }
0x145f   : > { %v3078_v49 = vsub.f32 %v3070_v45, %v3076_v37 }
0x1460   : > { %v3075_v50 = vpop.xlane.xlu0 %3074 }
0x1461   : > { %v3077_v53 = vmul.f32 0.0078125, %v3075_v50  ;;  %v3080_v52 = vmul.f32 %v3078_v49, %v3078_v49 }
0x1463   : > { %v3079_v54 = vsub.f32 %v3071_v46, %v3077_v53  ;;  %3082 = vadd.xlane.f32.xlu1 %v3080_v52 }
0x1465   : > { %v3081_v55 = vmul.f32 %v3079_v54, %v3079_v54 }
0x1467   : > { %3084 = vadd.xlane.f32.xlu1 %v3081_v55 }
0x14f0   : > { %v3083_v63 = vpop.xlane.xlu1 %3082 }
0x14f1   : > { %v3086_v47 = vmul.f32 0.0078125, %v3083_v63 }
0x14f3   : > { %v3088_v1 = vadd.f32 1e-05, %v3086_v47 }
0x14f4   : > { %v3085_v0 = vpop.xlane.xlu1 %3084 }
0x14f5   : > { %4088 = vrsqrt.f32 %v3088_v1  ;;  %v3087_v2 = vmul.f32 0.0078125, %v3085_v0 }
0x14f7   : > { %v3089_v3 = vadd.f32 1e-05, %v3087_v2 }
0x14f9   : > { %4090 = vrsqrt.f32 %v3089_v3 }
0x14ff   : > { %v4089_v5 = vpop.eup %4088 }
0x1500   : > { %v3092_v6 = vmul.f32 %v4089_v5, %v3078_v49 }
0x1502   : > { %v3098_v9 = vmul.f32 %v3097_v33, %v3092_v6 }
0x1503   : > { %v4091_v7 = vpop.eup %4090 }
0x1504   : > { %v3093_v8 = vmul.f32 %v4091_v7, %v3079_v54  ;;  %v3104_v13 = vadd.f32 %v3103_v10, %v3098_v9 }
0x1506   : > { %v3099_v12 = vmul.f32 %v3097_v33, %v3093_v8 }
0x1508   : > { %v3105_v14 = vadd.f32 %v3103_v10, %v3099_v12 }
0x150a   : > { %v3123_v17 = vpack.c.bf16 %v3105_v14, %v3104_v13 }
0x150c   : > { %3833 = vmatmul.mubr.bf16.vlgmr.msra.gmra.mrb[0].mxu0 %v3123_v17 }
0x15df   : > { %v3210_v11 = vpop.f32.mrb[0].mxu0 }
0x15e0   : > { %v3211_v21 = vadd.f32 %v3210_v11, %v3127_v20  ;;  %v3834_v22 = vpop.f32.mrb[1].mxu0 }
0x15e1   : > { %v3213_v23 = vpop.f32.mrb[2].mxu0 }
0x15e2   : > { %v3219_v24 = vmul.f32 0.70710677, %v3211_v21  ;;  %v3214_v25 = vadd.f32 %v3213_v23, %v3127_v20  ;;  %v3835_v26 = vpop.f32.mrb[3].mxu0  ;;  %v3217_v31 = vmul.f32 0.5, %v3211_v21 }
0x15e4   : > { %4092 = verf.f32 %v3219_v24  ;;  %v3220_v28 = vmul.f32 0.70710677, %v3214_v25  ;;  %v3218_v36 = vmul.f32 0.5, %v3214_v25 }
0x15e6   : > { %4094 = verf.f32 %v3220_v28 }
0x15ee   : > { %v4093_v29 = vpop.eup %4092 }
0x15ef   : > { %v3223_v32 = vadd.f32 1.0, %v4093_v29 }
0x15f0   : > { %v4095_v34 = vpop.eup %4094 }
0x15f1   : > { %v3225_v38 = vmul.f32 %v3223_v32, %v3217_v31  ;;  %v3224_v39 = vadd.f32 1.0, %v4095_v34 }
0x15f3   : > { %v3227_v40 = vsel %vm1638_vm3, %v3225_v38, 0.0  ;;  %v3226_v51 = vmul.f32 %v3224_v39, %v3218_v36 }
0x15f4   : > { %3228 = vadd.xlane.f32.xlu0 %v3227_v40 }
0x15f5   : > { %v3230_v27 = vsel %vm1638_vm3, %v3226_v51, 0.0 }
0x15f6   : > { %3231 = vadd.xlane.f32.xlu1 %v3230_v27 }
0x1681   : > { %v3229_v41 = vpop.xlane.xlu0 %3228 }
0x1682   : > { %v3234_v42 = vmul.f32 0.015625, %v3229_v41 }
0x1683   : > { %v3232_v43 = vpop.xlane.xlu1 %3231 }
0x1684   : > { %v3236_v44 = vsub.f32 %v3225_v38, %v3234_v42  ;;  %v3235_v45 = vmul.f32 0.015625, %v3232_v43 }
0x1686   : > { %v3237_v46 = vsub.f32 %v3226_v51, %v3235_v45  ;;  %v3238_v15 = vmul.f32 %v3236_v44, %v3236_v44 }
0x1688   : > { %v3240_v48 = vsel %vm1638_vm3, %v3238_v15, 0.0  ;;  %v3239_v30 = vmul.f32 %v3237_v46, %v3237_v46 }
0x1689   : > { %3241 = vadd.xlane.f32.xlu0 %v3240_v48 }
0x168a   : > { %v3243_v37 = vsel %vm1638_vm3, %v3239_v30, 0.0 }
0x168b   : > { %3244 = vadd.xlane.f32.xlu1 %v3243_v37 }
0x1716   : > { %v3242_v49 = vpop.xlane.xlu0 %3241 }
0x1717   : > { %v3246_v50 = vmul.f32 0.015625, %v3242_v49 }
0x1718   : > { %v3245_v53 = vpop.xlane.xlu1 %3244 }
0x1719   : > { %v3248_v52 = vadd.f32 1e-05, %v3246_v50  ;;  %v3247_v54 = vmul.f32 0.015625, %v3245_v53 }
0x171b   : > { %4096 = vrsqrt.f32 %v3248_v52  ;;  %v3249_v55 = vadd.f32 1e-05, %v3247_v54 }
0x171d   : > { %4098 = vrsqrt.f32 %v3249_v55 }
0x1725   : > { %v4097_v58 = vpop.eup %4096 }
0x1726   : > { %v3252_v59 = vmul.f32 %v4097_v58, %v3236_v44 }
0x1727   : > { %v4099_v60 = vpop.eup %4098 }
0x1728   : > { %v3258_v61 = vmul.f32 %v3257_v57, %v3252_v59  ;;  %v3253_v63 = vmul.f32 %v4099_v60, %v3237_v46 }
0x172a   : > { %v3264_v47 = vadd.f32 %v3263_v16, %v3258_v61  ;;  %v3259_v1 = vmul.f32 %v3257_v57, %v3253_v63 }
0x172c   : > { %v3270_v0 = vmul.f32 %v3269_v62, %v3264_v47  ;;  %v3265_v2 = vadd.f32 %v3263_v16, %v3259_v1 }
0x172e   : > { %v3272_v3 = vsel %vm1638_vm3, %v3270_v0, 0.0  ;;  %v3271_v4 = vmul.f32 %v3269_v62, %v3265_v2 }
0x172f   : > { %3273 = vadd.xlane.f32.xlu0 %v3272_v3 }
0x1730   : > { %v3275_v5 = vsel %vm1638_vm3, %v3271_v4, 0.0 }
0x1731   : > { %3276 = vadd.xlane.f32.xlu1 %v3275_v5 }
0x17bc   : > { %v3274_v6 = vpop.xlane.xlu0 %3273 }
0x17bd   : > { %v3285_v35 = vadd.f32 %v3557_v56, %v3274_v6 }
0x17be   : > { %v3277_v33 = vpop.xlane.xlu1 %3276 }
0x17bf   : > { %3288 = vst.msk [vmem:[%s4973_s11] sm:$0xff] %vm3287_vm6, %v3285_v35  ;;  %v3286_v19 = vadd.f32 %v3557_v56, %v3277_v33 }
0x17c1   : > { %3289 = vst.msk [vmem:[%s4973_s11 + $0x8] sm:$0xff] %vm3287_vm6, %v3286_v19 }
0x17c2 PF: > { %s4974_s26 = sld [smem:[#allocation12_spill]]  ;;  %s4975_s17 = sld [smem:[#allocation11_spill]] }
0x17c3   : > { %s4976_s25 = sld [smem:[#allocation13_spill]]  ;;  %s4977_s23 = smov %s4220_s24 }
0x17c8   : > { %p27_p12 = scmp.ge.s32.totalorder %s4974_s26, 4   ;;  %s4978_s24 = smov %s4975_s17 }
0x17ca   :  { %29 = sbr.rel (!%p27_p12) target bundleno = 8 (0x8), region = 145 }
0x17d1   :  { %3301 = vsyncpa [#allocation5], 1 }
0x17d2   :  { %3303 = vsyncpa [#allocation5 + $0x1], 1 }
0x17d3   :  { %3304 = vsyncpa [#allocation7], 1 }
0x17d4   :  { %3306 = vsyncpa [#allocation7 + $0x1], 1 }

</bundles_post_ra>
